<compile_context>
chip_gen: v5e
topology: v5e:2x2
jax: 0.10.0
libtpu: 0.0.40
codegen_flags: <defaults>
</compile_context>

<pallas_src>
import jax
import jax.numpy as jnp
from jax import lax
from jax.experimental import pallas as pl
from jax.experimental.pallas import tpu as pltpu


def sap_kernel(x_ref, wt_ref, b_ref, u_ref, o_ref, xm_ref):
    """Self-attentive pooling for a block of Bblk batch elements.

    x_ref  : (Bblk, C, M*T) input block in its native layout (no HBM relayout)
    wt_ref : (C, C)         W.weight transposed -> (in_dim, out_dim)
    b_ref  : (1, C)         W.bias
    u_ref  : (1, C)         attention vector u (stored as a row)
    o_ref  : (Bblk, C)      pooled embeddings for this batch block
    xm_ref : (Bblk*T, C)    VMEM scratch holding the n_mels-mean, lane-dense
    """
    bblk, c, mt = x_ref.shape
    t = xm_ref.shape[0] // bblk
    m = mt // t
    inv_m = 1.0 / m

    # --- preprocess: mean over n_mels, one batch element at a time ----------
    # Stream (C, M*T) -> one XLU transpose -> sum the M sublane groups of T
    # rows (VPU adds) -> park (T, C) in VMEM scratch.  Unrolled so only ~2
    # tiles of vregs are live at once (never the full 128-vreg block).
    def mean_body(b, carry):
        xt = x_ref[b].astype(jnp.float32).T                  # (M*T, C)
        xm_b = jnp.sum(xt.reshape(m, t, c), axis=0) * inv_m  # (T, C)
        row0 = pl.multiple_of(b * t, t)
        xm_ref[pl.ds(row0, t), :] = xm_b
        return carry

    lax.fori_loop(0, bblk, mean_body, 0, unroll=True)

    xm = xm_ref[...]                                          # (Bblk*T, C) f32

    # --- h = tanh(W x + b): one lane-dense MXU matmul ------------------------
    h = jnp.tanh(
        jnp.dot(xm, wt_ref[...], preferred_element_type=jnp.float32)
        + b_ref[...]
    )                                                         # (Bblk*T, C)

    # --- attention logits: <h, u> along the lane (C) axis -> (Bblk, T) -------
    logits = jnp.sum(h.reshape(bblk, t, c) * u_ref[...], axis=-1)

    # --- softmax over frames T (numerically stable; exact divide) ------------
    logits = logits - jnp.max(logits, axis=-1, keepdims=True)
    p = jnp.exp(logits)
    w = p / jnp.sum(p, axis=-1, keepdims=True)                # (Bblk, T)

    # --- weighted sum over frames -> (Bblk, C), unmasked lane-dense store ----
    e = jnp.sum(xm.reshape(bblk, t, c) * w[:, :, None], axis=1)
    o_ref[...] = e.astype(o_ref.dtype)


def self_attentive_pool2d(x, w_weight, w_bias, u, *, b_block=8):
    """x: (B, C, M, T); w_weight: (C, C); w_bias: (C,); u: (C, 1) -> (B, C) f32."""
    B, C, M, T = x.shape
    MT = M * T

    # Free view: M, T are the trailing contiguous dims (no HBM relayout).
    x_flat = x.reshape(B, C, MT)

    bblk = max(1, min(b_block, B))
    grid = (pl.cdiv(B, bblk),)   # no jnp.pad: partial tail block is masked

    wt = w_weight.T.astype(jnp.float32)             # (in, out) so that xm @ wt
    b2 = w_bias.reshape(1, C).astype(jnp.float32)
    u2 = u.reshape(1, C).astype(jnp.float32)        # u stored as a row

    return pl.pallas_call(
        sap_kernel,
        out_shape=jax.ShapeDtypeStruct((B, C), jnp.float32),
        grid_spec=pltpu.PrefetchScalarGridSpec(
            num_scalar_prefetch=0,
            grid=grid,
            in_specs=[
                # Explicit double-buffering so the per-step input DMA stays
                # overlapped with the (now smaller) per-step compute.
                pl.BlockSpec((bblk, C, MT), lambda b: (b, 0, 0),
                             pipeline_mode=pl.Buffered(2)),
                pl.BlockSpec((C, C), lambda b: (0, 0)),
                pl.BlockSpec((1, C), lambda b: (0, 0)),
                pl.BlockSpec((1, C), lambda b: (0, 0)),
            ],
            out_specs=pl.BlockSpec((bblk, C), lambda b: (b, 0)),
            scratch_shapes=[pltpu.VMEM((bblk * T, C), jnp.float32)],
        ),
        compiler_params=pltpu.CompilerParams(
            dimension_semantics=("parallel",),
        ),
    )(x_flat, wt, b2, u2)


def _reference(x, w_weight, w_bias, u):
    # Pure-JAX mirror of the PyTorch forward, for verification.
    xm = jnp.mean(x, axis=2)                      # (B, C, T)
    x_tc = jnp.transpose(xm, (0, 2, 1))           # (B, T, C)
    h = jnp.tanh(
        jnp.einsum("btc,oc->bto", x_tc, w_weight, precision="highest") + w_bias
    )
    w = jnp.einsum("btc,ck->btk", h, u, precision="highest")[..., 0]   # (B, T)
    w = jax.nn.softmax(w, axis=1)[..., None]      # (B, T, 1)
    return jnp.sum(x_tc * w, axis=1)              # (B, C)


if __name__ == "__main__":
    # C=128 keeps the channel dim lane-aligned; M*T = 128 is lane-dense for the
    # in-kernel transpose; B=16 with b_block=8 gives 2 "parallel" grid steps so
    # v7x's two TensorCores both get work (v5e/v6e simply loop the two steps).
    B, C, M, T = 16, 128, 8, 16
    key = jax.random.PRNGKey(0)
    kx, kw, kb, ku = jax.random.split(key, 4)

    x = jax.random.normal(kx, (B, C, M, T), dtype=jnp.float32)
    # Deterministic parameter init (xavier-normal-like scaling).
    w_weight = jax.random.normal(kw, (C, C), dtype=jnp.float32) * (2.0 / (C + C)) ** 0.5
    w_bias = jax.random.normal(kb, (C,), dtype=jnp.float32) * 0.01
    u = jax.random.normal(ku, (C, 1), dtype=jnp.float32) * (2.0 / (C + 1)) ** 0.5

    out = self_attentive_pool2d(x, w_weight, w_bias, u)
    out = jax.block_until_ready(out)

    ref = _reference(x, w_weight, w_bias, u)
    assert out.shape == (B, C)
    # Exact softmax divide + f32 MXU matmul: tight parity with the f32 reference.
    assert jnp.allclose(out, ref, atol=1e-4, rtol=1e-4), "mismatch vs reference"

    print("KERNEL_OK")
</pallas_src>

<mosaic_0001>
module attributes {stable_mosaic.version = 11 : i64} {
  func.func @sap_kernel(%arg0: i32, %arg1: memref<8x128x128xf32, #tpu.memory_space<vmem>>, %arg2: memref<128x128xf32, #tpu.memory_space<vmem>>, %arg3: memref<1x128xf32, #tpu.memory_space<vmem>>, %arg4: memref<1x128xf32, #tpu.memory_space<vmem>>, %arg5: memref<8x128xf32, #tpu.memory_space<vmem>>, %arg6: memref<128x128xf32, #tpu.memory_space<vmem>>) attributes {dimension_semantics = [#tpu.dimension_semantics<parallel>], iteration_bounds = array<i64: 2>, scalar_prefetch = 0 : i64, scratch_operands = 1 : i64, tpu.core_type = #tpu.core_type<tc>, window_params = [{pipeline_mode = #tpu.pipeline_mode<double_buffered>, transform_indices = @transform_0, window_bounds = array<i64: 8, 128, 128>}, {pipeline_mode = #tpu.pipeline_mode<synchronous>, transform_indices = @transform_1, window_bounds = array<i64: 128, 128>}, {pipeline_mode = #tpu.pipeline_mode<synchronous>, transform_indices = @transform_2, window_bounds = array<i64: 1, 128>}, {pipeline_mode = #tpu.pipeline_mode<synchronous>, transform_indices = @transform_3, window_bounds = array<i64: 1, 128>}, {transform_indices = @transform_4, window_bounds = array<i64: 8, 128>}]} {
    %c0_i32 = arith.constant 0 : i32
    %0 = arith.index_cast %c0_i32 : i32 to index
    %c0 = arith.constant 0 : index
    %c0_0 = arith.constant 0 : index
    %1 = vector.load %arg1[%0, %c0, %c0_0] : memref<8x128x128xf32, #tpu.memory_space<vmem>>, vector<1x128x128xf32>
    %2 = vector.shape_cast %1 : vector<1x128x128xf32> to vector<128x128xf32>
    %3 = tpu.transpose %2, [1, 0] : vector<128x128xf32> -> vector<128x128xf32>
    %4 = vector.shape_cast %3 : vector<128x128xf32> to vector<8x16x128xf32>
    %cst = arith.constant dense<0.000000e+00> : vector<16x128xf32>
    %5 = vector.multi_reduction <add>, %4, %cst [0] : vector<8x16x128xf32> to vector<16x128xf32>
    %cst_1 = arith.constant 1.250000e-01 : f32
    %6 = vector.broadcast %cst_1 : f32 to vector<16x128xf32>
    %7 = arith.mulf %5, %6 : vector<16x128xf32>
    %c16_i32 = arith.constant 16 : i32
    %8 = arith.muli %c0_i32, %c16_i32 : i32
    %9 = tpu.assume_multiple %8, 16 : i32
    %10 = arith.index_cast %9 : i32 to index
    %c0_2 = arith.constant 0 : index
    %11 = vector.load %arg6[%10, %c0_2] : memref<128x128xf32, #tpu.memory_space<vmem>>, vector<16x128xf32>
    tpu.vector_store %arg6[%10, %c0_2], %7 {strides = array<i32>} : memref<128x128xf32, #tpu.memory_space<vmem>>, vector<16x128xf32>,
    %c1_i32 = arith.constant 1 : i32
    %12 = arith.index_cast %c1_i32 : i32 to index
    %c0_3 = arith.constant 0 : index
    %c0_4 = arith.constant 0 : index
    %13 = vector.load %arg1[%12, %c0_3, %c0_4] : memref<8x128x128xf32, #tpu.memory_space<vmem>>, vector<1x128x128xf32>
    %14 = vector.shape_cast %13 : vector<1x128x128xf32> to vector<128x128xf32>
    %15 = tpu.transpose %14, [1, 0] : vector<128x128xf32> -> vector<128x128xf32>
    %16 = vector.shape_cast %15 : vector<128x128xf32> to vector<8x16x128xf32>
    %cst_5 = arith.constant dense<0.000000e+00> : vector<16x128xf32>
    %17 = vector.multi_reduction <add>, %16, %cst_5 [0] : vector<8x16x128xf32> to vector<16x128xf32>
    %cst_6 = arith.constant 1.250000e-01 : f32
    %18 = vector.broadcast %cst_6 : f32 to vector<16x128xf32>
    %19 = arith.mulf %17, %18 : vector<16x128xf32>
    %c16_i32_7 = arith.constant 16 : i32
    %20 = arith.muli %c1_i32, %c16_i32_7 : i32
    %21 = tpu.assume_multiple %20, 16 : i32
    %22 = arith.index_cast %21 : i32 to index
    %c0_8 = arith.constant 0 : index
    %23 = vector.load %arg6[%22, %c0_8] : memref<128x128xf32, #tpu.memory_space<vmem>>, vector<16x128xf32>
    tpu.vector_store %arg6[%22, %c0_8], %19 {strides = array<i32>} : memref<128x128xf32, #tpu.memory_space<vmem>>, vector<16x128xf32>,
    %c2_i32 = arith.constant 2 : i32
    %24 = arith.index_cast %c2_i32 : i32 to index
    %c0_9 = arith.constant 0 : index
    %c0_10 = arith.constant 0 : index
    %25 = vector.load %arg1[%24, %c0_9, %c0_10] : memref<8x128x128xf32, #tpu.memory_space<vmem>>, vector<1x128x128xf32>
    %26 = vector.shape_cast %25 : vector<1x128x128xf32> to vector<128x128xf32>
    %27 = tpu.transpose %26, [1, 0] : vector<128x128xf32> -> vector<128x128xf32>
    %28 = vector.shape_cast %27 : vector<128x128xf32> to vector<8x16x128xf32>
    %cst_11 = arith.constant dense<0.000000e+00> : vector<16x128xf32>
    %29 = vector.multi_reduction <add>, %28, %cst_11 [0] : vector<8x16x128xf32> to vector<16x128xf32>
    %cst_12 = arith.constant 1.250000e-01 : f32
    %30 = vector.broadcast %cst_12 : f32 to vector<16x128xf32>
    %31 = arith.mulf %29, %30 : vector<16x128xf32>
    %c16_i32_13 = arith.constant 16 : i32
    %32 = arith.muli %c2_i32, %c16_i32_13 : i32
    %33 = tpu.assume_multiple %32, 16 : i32
    %34 = arith.index_cast %33 : i32 to index
    %c0_14 = arith.constant 0 : index
    %35 = vector.load %arg6[%34, %c0_14] : memref<128x128xf32, #tpu.memory_space<vmem>>, vector<16x128xf32>
    tpu.vector_store %arg6[%34, %c0_14], %31 {strides = array<i32>} : memref<128x128xf32, #tpu.memory_space<vmem>>, vector<16x128xf32>,
    %c3_i32 = arith.constant 3 : i32
    %36 = arith.index_cast %c3_i32 : i32 to index
    %c0_15 = arith.constant 0 : index
    %c0_16 = arith.constant 0 : index
    %37 = vector.load %arg1[%36, %c0_15, %c0_16] : memref<8x128x128xf32, #tpu.memory_space<vmem>>, vector<1x128x128xf32>
    %38 = vector.shape_cast %37 : vector<1x128x128xf32> to vector<128x128xf32>
    %39 = tpu.transpose %38, [1, 0] : vector<128x128xf32> -> vector<128x128xf32>
    %40 = vector.shape_cast %39 : vector<128x128xf32> to vector<8x16x128xf32>
    %cst_17 = arith.constant dense<0.000000e+00> : vector<16x128xf32>
    %41 = vector.multi_reduction <add>, %40, %cst_17 [0] : vector<8x16x128xf32> to vector<16x128xf32>
    %cst_18 = arith.constant 1.250000e-01 : f32
    %42 = vector.broadcast %cst_18 : f32 to vector<16x128xf32>
    %43 = arith.mulf %41, %42 : vector<16x128xf32>
    %c16_i32_19 = arith.constant 16 : i32
    %44 = arith.muli %c3_i32, %c16_i32_19 : i32
    %45 = tpu.assume_multiple %44, 16 : i32
    %46 = arith.index_cast %45 : i32 to index
    %c0_20 = arith.constant 0 : index
    %47 = vector.load %arg6[%46, %c0_20] : memref<128x128xf32, #tpu.memory_space<vmem>>, vector<16x128xf32>
    tpu.vector_store %arg6[%46, %c0_20], %43 {strides = array<i32>} : memref<128x128xf32, #tpu.memory_space<vmem>>, vector<16x128xf32>,
    %c4_i32 = arith.constant 4 : i32
    %48 = arith.index_cast %c4_i32 : i32 to index
    %c0_21 = arith.constant 0 : index
    %c0_22 = arith.constant 0 : index
    %49 = vector.load %arg1[%48, %c0_21, %c0_22] : memref<8x128x128xf32, #tpu.memory_space<vmem>>, vector<1x128x128xf32>
    %50 = vector.shape_cast %49 : vector<1x128x128xf32> to vector<128x128xf32>
    %51 = tpu.transpose %50, [1, 0] : vector<128x128xf32> -> vector<128x128xf32>
    %52 = vector.shape_cast %51 : vector<128x128xf32> to vector<8x16x128xf32>
    %cst_23 = arith.constant dense<0.000000e+00> : vector<16x128xf32>
    %53 = vector.multi_reduction <add>, %52, %cst_23 [0] : vector<8x16x128xf32> to vector<16x128xf32>
    %cst_24 = arith.constant 1.250000e-01 : f32
    %54 = vector.broadcast %cst_24 : f32 to vector<16x128xf32>
    %55 = arith.mulf %53, %54 : vector<16x128xf32>
    %c16_i32_25 = arith.constant 16 : i32
    %56 = arith.muli %c4_i32, %c16_i32_25 : i32
    %57 = tpu.assume_multiple %56, 16 : i32
    %58 = arith.index_cast %57 : i32 to index
    %c0_26 = arith.constant 0 : index
    %59 = vector.load %arg6[%58, %c0_26] : memref<128x128xf32, #tpu.memory_space<vmem>>, vector<16x128xf32>
    tpu.vector_store %arg6[%58, %c0_26], %55 {strides = array<i32>} : memref<128x128xf32, #tpu.memory_space<vmem>>, vector<16x128xf32>,
    %c5_i32 = arith.constant 5 : i32
    %60 = arith.index_cast %c5_i32 : i32 to index
    %c0_27 = arith.constant 0 : index
    %c0_28 = arith.constant 0 : index
    %61 = vector.load %arg1[%60, %c0_27, %c0_28] : memref<8x128x128xf32, #tpu.memory_space<vmem>>, vector<1x128x128xf32>
    %62 = vector.shape_cast %61 : vector<1x128x128xf32> to vector<128x128xf32>
    %63 = tpu.transpose %62, [1, 0] : vector<128x128xf32> -> vector<128x128xf32>
    %64 = vector.shape_cast %63 : vector<128x128xf32> to vector<8x16x128xf32>
    %cst_29 = arith.constant dense<0.000000e+00> : vector<16x128xf32>
    %65 = vector.multi_reduction <add>, %64, %cst_29 [0] : vector<8x16x128xf32> to vector<16x128xf32>
    %cst_30 = arith.constant 1.250000e-01 : f32
    %66 = vector.broadcast %cst_30 : f32 to vector<16x128xf32>
    %67 = arith.mulf %65, %66 : vector<16x128xf32>
    %c16_i32_31 = arith.constant 16 : i32
    %68 = arith.muli %c5_i32, %c16_i32_31 : i32
    %69 = tpu.assume_multiple %68, 16 : i32
    %70 = arith.index_cast %69 : i32 to index
    %c0_32 = arith.constant 0 : index
    %71 = vector.load %arg6[%70, %c0_32] : memref<128x128xf32, #tpu.memory_space<vmem>>, vector<16x128xf32>
    tpu.vector_store %arg6[%70, %c0_32], %67 {strides = array<i32>} : memref<128x128xf32, #tpu.memory_space<vmem>>, vector<16x128xf32>,
    %c6_i32 = arith.constant 6 : i32
    %72 = arith.index_cast %c6_i32 : i32 to index
    %c0_33 = arith.constant 0 : index
    %c0_34 = arith.constant 0 : index
    %73 = vector.load %arg1[%72, %c0_33, %c0_34] : memref<8x128x128xf32, #tpu.memory_space<vmem>>, vector<1x128x128xf32>
    %74 = vector.shape_cast %73 : vector<1x128x128xf32> to vector<128x128xf32>
    %75 = tpu.transpose %74, [1, 0] : vector<128x128xf32> -> vector<128x128xf32>
    %76 = vector.shape_cast %75 : vector<128x128xf32> to vector<8x16x128xf32>
    %cst_35 = arith.constant dense<0.000000e+00> : vector<16x128xf32>
    %77 = vector.multi_reduction <add>, %76, %cst_35 [0] : vector<8x16x128xf32> to vector<16x128xf32>
    %cst_36 = arith.constant 1.250000e-01 : f32
    %78 = vector.broadcast %cst_36 : f32 to vector<16x128xf32>
    %79 = arith.mulf %77, %78 : vector<16x128xf32>
    %c16_i32_37 = arith.constant 16 : i32
    %80 = arith.muli %c6_i32, %c16_i32_37 : i32
    %81 = tpu.assume_multiple %80, 16 : i32
    %82 = arith.index_cast %81 : i32 to index
    %c0_38 = arith.constant 0 : index
    %83 = vector.load %arg6[%82, %c0_38] : memref<128x128xf32, #tpu.memory_space<vmem>>, vector<16x128xf32>
    tpu.vector_store %arg6[%82, %c0_38], %79 {strides = array<i32>} : memref<128x128xf32, #tpu.memory_space<vmem>>, vector<16x128xf32>,
    %c7_i32 = arith.constant 7 : i32
    %84 = arith.index_cast %c7_i32 : i32 to index
    %c0_39 = arith.constant 0 : index
    %c0_40 = arith.constant 0 : index
    %85 = vector.load %arg1[%84, %c0_39, %c0_40] : memref<8x128x128xf32, #tpu.memory_space<vmem>>, vector<1x128x128xf32>
    %86 = vector.shape_cast %85 : vector<1x128x128xf32> to vector<128x128xf32>
    %87 = tpu.transpose %86, [1, 0] : vector<128x128xf32> -> vector<128x128xf32>
    %88 = vector.shape_cast %87 : vector<128x128xf32> to vector<8x16x128xf32>
    %cst_41 = arith.constant dense<0.000000e+00> : vector<16x128xf32>
    %89 = vector.multi_reduction <add>, %88, %cst_41 [0] : vector<8x16x128xf32> to vector<16x128xf32>
    %cst_42 = arith.constant 1.250000e-01 : f32
    %90 = vector.broadcast %cst_42 : f32 to vector<16x128xf32>
    %91 = arith.mulf %89, %90 : vector<16x128xf32>
    %c16_i32_43 = arith.constant 16 : i32
    %92 = arith.muli %c7_i32, %c16_i32_43 : i32
    %93 = tpu.assume_multiple %92, 16 : i32
    %94 = arith.index_cast %93 : i32 to index
    %c0_44 = arith.constant 0 : index
    %95 = vector.load %arg6[%94, %c0_44] : memref<128x128xf32, #tpu.memory_space<vmem>>, vector<16x128xf32>
    tpu.vector_store %arg6[%94, %c0_44], %91 {strides = array<i32>} : memref<128x128xf32, #tpu.memory_space<vmem>>, vector<16x128xf32>,
    %c8_i32 = arith.constant 8 : i32
    %c0_45 = arith.constant 0 : index
    %c0_46 = arith.constant 0 : index
    %96 = vector.load %arg6[%c0_45, %c0_46] : memref<128x128xf32, #tpu.memory_space<vmem>>, vector<128x128xf32>
    %c0_47 = arith.constant 0 : index
    %c0_48 = arith.constant 0 : index
    %97 = vector.load %arg2[%c0_47, %c0_48] : memref<128x128xf32, #tpu.memory_space<vmem>>, vector<128x128xf32>
    %cst_49 = arith.constant dense<0.000000e+00> : vector<128x128xf32>
    %98 = tpu.matmul %96, %97, %cst_49 {dimension_numbers = #tpu.dot_dimension_numbers<[1], [0], [0], [1], [0, 0, 1, 1], [], []>} : vector<128x128xf32>, vector<128x128xf32>, vector<128x128xf32> -> vector<128x128xf32>
    %c0_50 = arith.constant 0 : index
    %c0_51 = arith.constant 0 : index
    %99 = vector.load %arg3[%c0_50, %c0_51] : memref<1x128xf32, #tpu.memory_space<vmem>>, vector<1x128xf32>
    %100 = vector.broadcast %99 : vector<1x128xf32> to vector<128x128xf32>
    %101 = arith.addf %98, %100 : vector<128x128xf32>
    %102 = math.tanh %101 : vector<128x128xf32>
    %103 = vector.shape_cast %102 : vector<128x128xf32> to vector<8x16x128xf32>
    %c0_52 = arith.constant 0 : index
    %c0_53 = arith.constant 0 : index
    %104 = vector.load %arg4[%c0_52, %c0_53] : memref<1x128xf32, #tpu.memory_space<vmem>>, vector<1x128xf32>
    %105 = vector.shape_cast %104 : vector<1x128xf32> to vector<1x1x128xf32>
    %106 = vector.broadcast %105 : vector<1x1x128xf32> to vector<8x16x128xf32>
    %107 = arith.mulf %103, %106 : vector<8x16x128xf32>
    %cst_54 = arith.constant dense<0.000000e+00> : vector<8x16xf32>
    %108 = vector.multi_reduction <add>, %107, %cst_54 [2] : vector<8x16x128xf32> to vector<8x16xf32>
    %cst_55 = arith.constant dense<0xFF800000> : vector<8xf32>
    %109 = vector.multi_reduction <maximumf>, %108, %cst_55 [1] : vector<8x16xf32> to vector<8xf32>
    %110 = vector.shape_cast %109 : vector<8xf32> to vector<8x1xf32>
    %111 = vector.broadcast %110 : vector<8x1xf32> to vector<8x16xf32>
    %112 = arith.subf %108, %111 : vector<8x16xf32>
    %113 = math.exp %112 : vector<8x16xf32>
    %cst_56 = arith.constant dense<0.000000e+00> : vector<8xf32>
    %114 = vector.multi_reduction <add>, %113, %cst_56 [1] : vector<8x16xf32> to vector<8xf32>
    %115 = vector.shape_cast %114 : vector<8xf32> to vector<8x1xf32>
    %116 = vector.broadcast %115 : vector<8x1xf32> to vector<8x16xf32>
    %117 = arith.divf %113, %116 : vector<8x16xf32>
    %118 = vector.shape_cast %96 : vector<128x128xf32> to vector<8x16x128xf32>
    %119 = vector.shape_cast %117 : vector<8x16xf32> to vector<8x16x1xf32>
    %120 = vector.broadcast %119 : vector<8x16x1xf32> to vector<8x16x128xf32>
    %121 = arith.mulf %118, %120 : vector<8x16x128xf32>
    %cst_57 = arith.constant dense<0.000000e+00> : vector<8x128xf32>
    %122 = vector.multi_reduction <add>, %121, %cst_57 [1] : vector<8x16x128xf32> to vector<8x128xf32>
    %c0_58 = arith.constant 0 : index
    %c0_59 = arith.constant 0 : index
    %123 = vector.load %arg5[%c0_58, %c0_59] : memref<8x128xf32, #tpu.memory_space<vmem>>, vector<8x128xf32>
    tpu.vector_store %arg5[%c0_58, %c0_59], %122 {strides = array<i32>} : memref<8x128xf32, #tpu.memory_space<vmem>>, vector<8x128xf32>,
    return
  }
  func.func @transform_0(%arg0: i32) -> (i32, i32, i32) {
    %c0_i32 = arith.constant 0 : i32
    %c0_i32_0 = arith.constant 0 : i32
    %c0_i32_1 = arith.constant 0 : i32
    return %arg0, %c0_i32, %c0_i32_0 : i32, i32, i32
  }
  func.func @transform_1(%arg0: i32) -> (i32, i32) {
    %c0_i32 = arith.constant 0 : i32
    %c0_i32_0 = arith.constant 0 : i32
    %c0_i32_1 = arith.constant 0 : i32
    return %c0_i32, %c0_i32_0 : i32, i32
  }
  func.func @transform_2(%arg0: i32) -> (i32, i32) {
    %c0_i32 = arith.constant 0 : i32
    %c0_i32_0 = arith.constant 0 : i32
    %c0_i32_1 = arith.constant 0 : i32
    return %c0_i32, %c0_i32_0 : i32, i32
  }
  func.func @transform_3(%arg0: i32) -> (i32, i32) {
    %c0_i32 = arith.constant 0 : i32
    %c0_i32_0 = arith.constant 0 : i32
    %c0_i32_1 = arith.constant 0 : i32
    return %c0_i32, %c0_i32_0 : i32, i32
  }
  func.func @transform_4(%arg0: i32) -> (i32, i32) {
    %c0_i32 = arith.constant 0 : i32
    %c0_i32_0 = arith.constant 0 : i32
    return %arg0, %c0_i32 : i32, i32
  }
}

</mosaic_0001>

<bundles_post_ra>
// kernel: tpu_custom_call.1
= control target key start
LH: loop header
LB: loop body
LE: loop exit
PB: predicated region body
PF: predicated region fallthrough
CT: control target
= control target key end

     0   :  { %9 = vsyncpa [#allocation4], 0  ;;  %s2843_s0 = inlined_call_operand.hbm [shape: f32[16,128,128], index: 0, kind: input, shape index: {}]   ;;  %s2844_s1 = inlined_call_operand.hbm [shape: f32[128,128], index: 1, kind: input, shape index: {}]   ;;  %s2845_s2 = inlined_call_operand.vmem [shape: f32[1,128], index: 2, kind: input, shape index: {}]   ;;  %s2846_s3 = inlined_call_operand.vmem [shape: f32[1,128], index: 3, kind: input, shape index: {}]   ;;  %s2847_s4 = inlined_call_operand.hbm [shape: f32[16,128], index: 4, kind: output, shape index: {}]  }
   0x1   :  { %11 = vsyncpa [#allocation4 + $0x1], 0 }
   0x2   :  { %12 = vsyncpa [#allocation7], 0 }
   0x3   :  { %13 = vsyncpa [#allocation5], 0 }
   0x4   :  { %15 = vsyncpa [#allocation5 + $0x1], 0  ;;  %s2069_s15 = smov 0   ;;  %s2071_s16 = smov 0  }
   0x5   :  { %s2073_s17 = smov 0   ;;  %s2075_s18 = smov 0  }
   0x6 LB: > { %s2090_s19 = sadd.s32 4294967295, %s2038_s18   ;;  %s1585_s20 = sadd.s32 4294967294, %s2038_s18   ;;  %s2038_s18 = sphi %s2075_s18, %s2859_s18   ;;  %s2034_s17 = sphi %s2073_s17, %s2858_s17   ;;  %s2030_s16 = sphi %s2071_s16, %s2857_s16   ;;  %s2026_s15 = sphi %s2069_s15, %s2856_s15  }
   0x7   : > { %p41_p0 = scmp.ne.s32.totalorder %s2030_s16, %s2026_s15  ;;  %p42_p1 = scmp.eq.s32.totalorder %s2090_s19, 0 }
   0x8   : > { %p128_p2 = scmp.eq.s32.totalorder %s2090_s19, 1  ;;  %p134_p3 = scmp.eq.s32.totalorder %s1585_s20, 1 }
   0x9   : > { %p2099_p4 = por %p42_p1, %p41_p0  ;;  %p1586_p5 = scmp.ge.s32.totalorder %s2038_s18, 1 }
   0xa   : > { %p2104_p6 = por %p134_p3, %p41_p0  ;;  %p141_p7 = scmp.lt.s32.totalorder %s2038_s18, 3 }
   0xb   : > { %s152_s25 = sshll.u32 %s2844_s1, 4  ;;  %s2040_s27 = smov [#allocation6]   ;;  %s153_s25 = int_to_ptr.hbm [resolvable:$true] %s152_s25 }
   0xc   : > { %p2112_p8 = pnand %p1586_p5, %p141_p7  ;;  %s154_s28 = sshll.u32 %s2040_s27, 4  ;;  %s155_s28 = int_to_ptr.vmem [resolvable:$true] %s154_s28 }
   0xd   : > { %s2122_s29 = sadd.s32 1, %s2038_s18   ;;  %s2041_s30 = smov 128  }
   0xe   : > { %p1771_p9 = pneg %p2112_p8  ;;  %s2042_s5 = smov 8  }
   0xf   : > { %s25_s6 = ssub.s32 %s2038_s18, %s2122_s29  ;;  %s28_s7 = sadd.s32 1, %s2034_s17 }
  0x10   : > { %p1772_p10 = pnand %p1771_p9, %p42_p1  ;;  %p26_p12 = scmp.eq.s32.totalorder %s25_s6, 0 }
  0x11   : > { %p35_p13 = scmp.ne.s32.totalorder %s2034_s17, %s2030_s16  ;;  %p36_p0 = scmp.eq.s32.totalorder %s2038_s18, 0 }
  0x12   : > { %1774 = dma.hbm_to_vmem [thread:$0]  (!%p1772_p10), %s153_s25, 2048, %s155_s28, [#allocation7], %s2041_s30, %s2041_s30, %s2042_s5  }
  0x13   : > { %s2134_s8 = scalar_select %p26_p12, %s2034_s17, %s28_s7  }
  0x14   : > { %p2138_p3 = por %p128_p2, %p35_p13  ;;  %p1784_p5 = scmp.lt.s32.totalorder %s2038_s18, 2 }
  0x15   : > { %s174_s10 = sand.u32 1, %s2034_s17   ;;  %s1714_s11 = sshll.u32 %s2038_s18, 10 }
  0x16   : > { %p37_p7 = por %p36_p0, %p35_p13  ;;  %s1589_s12 = sshll.u32 %s174_s10, 10 }
  0x17   : > { %s184_s20 = scalar_lea.hbm %s2843_s0, %s1714_s11  ;;  %s178_s24 = scalar_lea.vmem [#allocation3], %s1589_s12 }
  0x18   : > { %s185_s23 = sshll.u32 %s184_s20, 4  ;;  %s187_s25 = sshll.u32 %s178_s24, 4  ;;  %s186_s23 = int_to_ptr.hbm [resolvable:$true] %s185_s23  ;;  %s188_s25 = int_to_ptr.vmem [resolvable:$true] %s187_s25 }
  0x19   : > { %p2148_p9 = pnand %p1784_p5, %p37_p7  ;;  %s175_s28 = scalar_lea.sflag [#allocation4], %s174_s10 }
  0x1a   : > { %s1938_s6 = sshra.s32 %s186_s23, 4  ;;  %s1945_s12 = scalar_lea.hbm %s2843_s0, 2048  ;;  %s1939_s6 = int_to_ptr.hbm [resolvable:$true] %s1938_s6 }
  0x1b   : > { %s1940_s7 = scalar_lea.hbm %s1939_s6, 1024  ;;  %p1942_p10 = pneg %p2148_p9 }
  0x1c   : > { %p1941_p2 = scmp.ne.s32.totalorder %s1939_s6, %s1940_s7  ;;  %p1946_p0 = scmp.lt.s32.totalorder %s1939_s6, %s2843_s0 }
  0x1d   : > { %p1947_p5 = scmp.lt.s32.totalorder %s1945_s12, %s1940_s7 }
  0x1e   : > { %p1943_p12 = pnand %p1942_p10, %p1941_p2 }
  0x1f   : > { %p1948_p7 = por %p1947_p5, %p1946_p0 }
  0x20   : > { %p1944_p13 = pneg %p1943_p12 }
  0x22   : > { %p1949_p11 = pnand %p1948_p7, %p1944_p13 }
  0x24   : > { %1952 = shalt.err (!%p1949_p11)
}
  0x25   : > { %1778 = dma.hbm_to_vmem [thread:$0]  (!%p2148_p9), %s186_s23, 16384, %s188_s25, %s175_s28, %s2041_s30, %s2041_s30, %s2042_s5  }
  0x26   : > { %199 = sbr.rel (%p2112_p8) target bundleno = 1525 (0x5f5), region = 36  ;;  %s2168_s10 = sand.u32 (!%p2112_p8), 1, %s2030_s16  }
  0x27   : > { %s1594_s24 = sshll.u32 (!%p2112_p8), %s2168_s10, 10  ;;  %s202_s6 = scalar_lea.sflag (!%p2112_p8), [#allocation4], %s2168_s10 }
  0x28   : > { %s2172_s7 = scalar_lea.vmem (!%p2112_p8), [#allocation3], %s1594_s24 }
  0x2b   : > { %2013 = dma.done.wait (%p2099_p4), %s202_s6, 16384  }
  0x2c   : > { %2015 = vsyncadd (%p2099_p4), %s202_s6, 4294950912 }
  0x2d   : > { %2017 = dma.done.wait (%p42_p1), [#allocation7], 2048  }
  0x2e   : > { %2019 = vsyncadd (%p42_p1), [#allocation7], 4294965248  ;;  %v1597_v0 = vld [vmem:[%s2172_s7 + $0x80] sm:$0xff]  ;;  %v1598_v2 = vld [vmem:[%s2172_s7 + $0x88] sm:$0xff]  ;;  %vm969_vm0 = vcmask 130112   ;;  %vm992_vm1 = vcmask 1041409  }
  0x2f   : > { %v237_v1 = vld [vmem:[%s2172_s7] sm:$0xff]  ;;  %320 = vxpose.xlu1.b32.start [1/16] %v1597_v0, 128  ;;  %v238_v3 = vld [vmem:[%s2172_s7 + $0x8] sm:$0xff]  ;;  %v1599_v5 = vld [vmem:[%s2172_s7 + $0x90] sm:$0xff]  ;;  %vm994_vm2 = vcmask 1042434   ;;  %vm996_vm3 = vcmask 1043459   ;;  %vm998_vm4 = vcmask 1044484  }
  0x30   : > { %253 = vxpose.xlu0.b32.start [1/16] %v237_v1, 128  ;;  %v1613_v4 = vld [vmem:[%s2172_s7 + $0x100] sm:$0xff]  ;;  %v239_v6 = vld [vmem:[%s2172_s7 + $0x10] sm:$0xff]  ;;  %v1614_v7 = vld [vmem:[%s2172_s7 + $0x108] sm:$0xff]  ;;  %vm1000_vm5 = vcmask 1045509   ;;  %vm1002_vm6 = vcmask 1046534   ;;  %vm1004_vm7 = vcmask 1047559  }
  0x31   : > { %388 = vxpose.xlu2.b32.start [1/16] %v1613_v4, 128  ;;  %v1600_v8 = vld [vmem:[%s2172_s7 + $0x98] sm:$0xff]  ;;  %v1615_v10 = vld [vmem:[%s2172_s7 + $0x110] sm:$0xff]  ;;  %v1601_v11 = vld [vmem:[%s2172_s7 + $0xa0] sm:$0xff]  ;;  %vm1007_vm8 = vcmask 130048   ;;  %s1596_s23 = sshll.u32 %s2168_s10, 3  ;;  %s1710_s25 = sshll.u32 %s2090_s19, 3 }
  0x32   : > { %v240_v9 = vld [vmem:[%s2172_s7 + $0x18] sm:$0xff]  ;;  %v241_v12 = vld [vmem:[%s2172_s7 + $0x20] sm:$0xff]  ;;  %v1602_v14 = vld [vmem:[%s2172_s7 + $0xa8] sm:$0xff]  ;;  %s1500_s11 = scalar_lea.hbm %s2847_s4, %s1710_s25  ;;  %s235_s19 = scalar_lea.vmem [#allocation8], %s1596_s23 }
  0x33   : > { %v1616_v13 = vld [vmem:[%s2172_s7 + $0x118] sm:$0xff]  ;;  %v242_v15 = vld [vmem:[%s2172_s7 + $0x28] sm:$0xff]  ;;  %v1617_v16 = vld [vmem:[%s2172_s7 + $0x120] sm:$0xff]  ;;  %s1502_s13 = sshll.u32 %s235_s19, 4  ;;  %s1504_s12 = sshll.u32 %s1500_s11, 4  ;;  %s1503_s13 = int_to_ptr.vmem [resolvable:$true] %s1502_s13  ;;  %s1505_s12 = int_to_ptr.hbm [resolvable:$true] %s1504_s12 }
  0x34   : > { %v1603_v17 = vld [vmem:[%s2172_s7 + $0xb0] sm:$0xff]  ;;  %v1618_v19 = vld [vmem:[%s2172_s7 + $0x128] sm:$0xff]  ;;  %v1604_v20 = vld [vmem:[%s2172_s7 + $0xb8] sm:$0xff]  ;;  %s1490_s14 = scalar_lea.sflag [#allocation5], %s2168_s10  ;;  %s1982_s20 = sshra.s32 %s1505_s12, 4  ;;  %s1983_s20 = int_to_ptr.hbm [resolvable:$true] %s1982_s20 }
  0x35   : > { %v243_v18 = vld [vmem:[%s2172_s7 + $0x30] sm:$0xff]  ;;  %v244_v21 = vld [vmem:[%s2172_s7 + $0x38] sm:$0xff]  ;;  %v1605_v23 = vld [vmem:[%s2172_s7 + $0xc0] sm:$0xff]  ;;  %s1984_s24 = scalar_lea.hbm %s1983_s20, 8  ;;  %s1988_s21 = scalar_lea.hbm %s2847_s4, 16 }
  0x36   : > { %v1619_v22 = vld [vmem:[%s2172_s7 + $0x130] sm:$0xff]  ;;  %v245_v24 = vld [vmem:[%s2172_s7 + $0x40] sm:$0xff]  ;;  %v1620_v25 = vld [vmem:[%s2172_s7 + $0x138] sm:$0xff]  ;;  %p1985_p1 = scmp.ne.s32.totalorder %s1983_s20, %s1984_s24  ;;  %p1989_p11 = scmp.lt.s32.totalorder %s1983_s20, %s2847_s4 }
  0x37   : > { %321 = vxpose.xlu1.b32.cont [2/16] %v1598_v2, 128  ;;  %v1606_v26 = vld [vmem:[%s2172_s7 + $0xc8] sm:$0xff]  ;;  %v1621_v28 = vld [vmem:[%s2172_s7 + $0x140] sm:$0xff]  ;;  %v1607_v29 = vld [vmem:[%s2172_s7 + $0xd0] sm:$0xff]  ;;  %p1990_p9 = scmp.lt.s32.totalorder %s1988_s21, %s1984_s24 }
  0x38   : > { %254 = vxpose.xlu0.b32.cont [2/16] %v238_v3, 128  ;;  %v246_v27 = vld [vmem:[%s2172_s7 + $0x48] sm:$0xff]  ;;  %v247_v30 = vld [vmem:[%s2172_s7 + $0x50] sm:$0xff]  ;;  %v1608_v32 = vld [vmem:[%s2172_s7 + $0xd8] sm:$0xff]  ;;  %p1986_p4 = pnand %p1985_p1, %p2138_p3 }
  0x39   : > { %389 = vxpose.xlu2.b32.cont [2/16] %v1614_v7, 128  ;;  %v1622_v31 = vld [vmem:[%s2172_s7 + $0x148] sm:$0xff]  ;;  %v248_v33 = vld [vmem:[%s2172_s7 + $0x58] sm:$0xff]  ;;  %v1623_v34 = vld [vmem:[%s2172_s7 + $0x150] sm:$0xff]  ;;  %p1991_p2 = por %p1990_p9, %p1989_p11 }
  0x3a   : > { %v1609_v35 = vld [vmem:[%s2172_s7 + $0xe0] sm:$0xff]  ;;  %v1624_v37 = vld [vmem:[%s2172_s7 + $0x158] sm:$0xff]  ;;  %v1610_v38 = vld [vmem:[%s2172_s7 + $0xe8] sm:$0xff]  ;;  %p1987_p8 = pneg %p1986_p4 }
  0x3b   : > { %v249_v36 = vld [vmem:[%s2172_s7 + $0x60] sm:$0xff]  ;;  %v250_v39 = vld [vmem:[%s2172_s7 + $0x68] sm:$0xff]  ;;  %v1611_v41 = vld [vmem:[%s2172_s7 + $0xf0] sm:$0xff] }
  0x3c   : > { %v1625_v40 = vld [vmem:[%s2172_s7 + $0x160] sm:$0xff]  ;;  %v251_v42 = vld [vmem:[%s2172_s7 + $0x70] sm:$0xff]  ;;  %v1626_v43 = vld [vmem:[%s2172_s7 + $0x168] sm:$0xff]  ;;  %p1992_p10 = pnand %p1991_p2, %p1987_p8 }
  0x3d   : > { %v1612_v44 = vld [vmem:[%s2172_s7 + $0xf8] sm:$0xff]  ;;  %v1627_v46 = vld [vmem:[%s2172_s7 + $0x170] sm:$0xff]  ;;  %v1645_v47 = vld [vmem:[%s2172_s7 + $0x200] sm:$0xff] }
  0x3e   : > { %v252_v45 = vld [vmem:[%s2172_s7 + $0x78] sm:$0xff]  ;;  %v1629_v48 = vld [vmem:[%s2172_s7 + $0x180] sm:$0xff]  ;;  %v1646_v50 = vld [vmem:[%s2172_s7 + $0x208] sm:$0xff] }
  0x3f   : > { %322 = vxpose.xlu1.b32.cont [3/16] %v1599_v5, 128  ;;  %v1628_v49 = vld [vmem:[%s2172_s7 + $0x178] sm:$0xff]  ;;  %v1630_v51 = vld [vmem:[%s2172_s7 + $0x188] sm:$0xff]  ;;  %v1677_v52 = vld [vmem:[%s2172_s7 + $0x300] sm:$0xff] }
  0x40   : > { %255 = vxpose.xlu0.b32.cont [3/16] %v239_v6, 128  ;;  %v1647_v53 = vld [vmem:[%s2172_s7 + $0x210] sm:$0xff]  ;;  %v1648_v55 = vld [vmem:[%s2172_s7 + $0x218] sm:$0xff]  ;;  %v1678_v57 = vld [vmem:[%s2172_s7 + $0x308] sm:$0xff] }
  0x41   : > { %390 = vxpose.xlu2.b32.cont [3/16] %v1615_v10, 128  ;;  %v1631_v54 = vld [vmem:[%s2172_s7 + $0x190] sm:$0xff]  ;;  %v1632_v56 = vld [vmem:[%s2172_s7 + $0x198] sm:$0xff]  ;;  %v1649_v58 = vld [vmem:[%s2172_s7 + $0x220] sm:$0xff] }
  0x42   : > { %v1633_v59 = vld [vmem:[%s2172_s7 + $0x1a0] sm:$0xff]  ;;  %v1679_v60 = vld [vmem:[%s2172_s7 + $0x310] sm:$0xff]  ;;  %v1650_v63 = vld [vmem:[%s2172_s7 + $0x228] sm:$0xff] }
  0x43   : > { %v1634_v0 = vld [vmem:[%s2172_s7 + $0x1a8] sm:$0xff]  ;;  %v1680_v1 = vld [vmem:[%s2172_s7 + $0x318] sm:$0xff]  ;;  %v1651_v5 = vld [vmem:[%s2172_s7 + $0x230] sm:$0xff] }
  0x44   : > { %v1635_v6 = vld [vmem:[%s2172_s7 + $0x1b0] sm:$0xff]  ;;  %v1681_v7 = vld [vmem:[%s2172_s7 + $0x320] sm:$0xff] }
  0x47   : > { %323 = vxpose.xlu1.b32.cont [4/16] %v1600_v8, 128 }
  0x48   : > { %256 = vxpose.xlu0.b32.cont [4/16] %v240_v9, 128 }
  0x49   : > { %391 = vxpose.xlu2.b32.cont [4/16] %v1616_v13, 128  ;;  %v1682_v13 = vld [vmem:[%s2172_s7 + $0x328] sm:$0xff] }
  0x4f   : > { %324 = vxpose.xlu1.b32.cont [5/16] %v1601_v11, 128  ;;  %v1652_v11 = vld [vmem:[%s2172_s7 + $0x238] sm:$0xff] }
  0x50   : > { %257 = vxpose.xlu0.b32.cont [5/16] %v241_v12, 128  ;;  %v1636_v12 = vld [vmem:[%s2172_s7 + $0x1b8] sm:$0xff] }
  0x51   : > { %392 = vxpose.xlu2.b32.cont [5/16] %v1617_v16, 128 }
  0x57   : > { %325 = vxpose.xlu1.b32.cont [6/16] %v1602_v14, 128 }
  0x58   : > { %258 = vxpose.xlu0.b32.cont [6/16] %v242_v15, 128 }
  0x59   : > { %393 = vxpose.xlu2.b32.cont [6/16] %v1618_v19, 128  ;;  %v1683_v19 = vld [vmem:[%s2172_s7 + $0x330] sm:$0xff] }
  0x5f   : > { %326 = vxpose.xlu1.b32.cont [7/16] %v1603_v17, 128  ;;  %v1653_v17 = vld [vmem:[%s2172_s7 + $0x240] sm:$0xff] }
  0x60   : > { %259 = vxpose.xlu0.b32.cont [7/16] %v243_v18, 128  ;;  %v1637_v18 = vld [vmem:[%s2172_s7 + $0x1c0] sm:$0xff] }
  0x61   : > { %394 = vxpose.xlu2.b32.cont [7/16] %v1619_v22, 128 }
  0x67   : > { %327 = vxpose.xlu1.b32.cont [8/16] %v1604_v20, 128 }
  0x68   : > { %260 = vxpose.xlu0.b32.cont [8/16] %v244_v21, 128 }
  0x69   : > { %395 = vxpose.xlu2.b32.cont [8/16] %v1620_v25, 128  ;;  %v1684_v25 = vld [vmem:[%s2172_s7 + $0x338] sm:$0xff] }
  0x6f   : > { %328 = vxpose.xlu1.b32.cont [9/16] %v1605_v23, 128  ;;  %v1654_v23 = vld [vmem:[%s2172_s7 + $0x248] sm:$0xff] }
  0x70   : > { %261 = vxpose.xlu0.b32.cont [9/16] %v245_v24, 128  ;;  %v1638_v24 = vld [vmem:[%s2172_s7 + $0x1c8] sm:$0xff] }
  0x71   : > { %396 = vxpose.xlu2.b32.cont [9/16] %v1621_v28, 128 }
  0x77   : > { %329 = vxpose.xlu1.b32.cont [10/16] %v1606_v26, 128 }
  0x78   : > { %262 = vxpose.xlu0.b32.cont [10/16] %v246_v27, 128 }
  0x79   : > { %397 = vxpose.xlu2.b32.cont [10/16] %v1622_v31, 128  ;;  %v1685_v31 = vld [vmem:[%s2172_s7 + $0x340] sm:$0xff] }
  0x7f   : > { %330 = vxpose.xlu1.b32.cont [11/16] %v1607_v29, 128  ;;  %v1655_v29 = vld [vmem:[%s2172_s7 + $0x250] sm:$0xff] }
  0x80   : > { %263 = vxpose.xlu0.b32.cont [11/16] %v247_v30, 128  ;;  %v1639_v30 = vld [vmem:[%s2172_s7 + $0x1d0] sm:$0xff] }
  0x81   : > { %398 = vxpose.xlu2.b32.cont [11/16] %v1623_v34, 128 }
  0x87   : > { %331 = vxpose.xlu1.b32.cont [12/16] %v1608_v32, 128 }
  0x88   : > { %264 = vxpose.xlu0.b32.cont [12/16] %v248_v33, 128 }
  0x89   : > { %399 = vxpose.xlu2.b32.cont [12/16] %v1624_v37, 128  ;;  %v1686_v37 = vld [vmem:[%s2172_s7 + $0x348] sm:$0xff] }
  0x8f   : > { %332 = vxpose.xlu1.b32.cont [13/16] %v1609_v35, 128  ;;  %v1656_v35 = vld [vmem:[%s2172_s7 + $0x258] sm:$0xff] }
  0x90   : > { %265 = vxpose.xlu0.b32.cont [13/16] %v249_v36, 128  ;;  %v1640_v36 = vld [vmem:[%s2172_s7 + $0x1d8] sm:$0xff] }
  0x91   : > { %400 = vxpose.xlu2.b32.cont [13/16] %v1625_v40, 128  ;;  %v809_v40 = vld [vmem:[#allocation6 + $0x70] sm:$0xff] }
  0x97   : > { %333 = vxpose.xlu1.b32.cont [14/16] %v1610_v38, 128 }
  0x98   : > { %266 = vxpose.xlu0.b32.cont [14/16] %v250_v39, 128  ;;  %v810_v39 = vld [vmem:[#allocation6 + $0x78] sm:$0xff] }
  0x99   : > { %401 = vxpose.xlu2.b32.cont [14/16] %v1626_v43, 128  ;;  %815 = vmatpush.msra.mxu0 %v810_v39  ;;  %v1657_v43 = vld [vmem:[%s2172_s7 + $0x260] sm:$0xff] }
  0x9a   : > { %1715 = vmatpush.msra.mxu1 %v810_v39  ;;  %1716 = vmatpush.msra.mxu2 %v810_v39 }
  0x9b   : > { %1717 = vmatpush.msra.mxu3 %v810_v39  ;;  %816 = vmatpush.msra.mxu0 %v809_v40  ;;  %v1661_v39 = vld [vmem:[%s2172_s7 + $0x280] sm:$0xff] }
  0x9c   : > { %1718 = vmatpush.msra.mxu1 %v809_v40  ;;  %1719 = vmatpush.msra.mxu2 %v809_v40 }
  0x9d   : > { %1720 = vmatpush.msra.mxu3 %v809_v40  ;;  %v1691_v40 = vld [vmem:[%s2172_s7 + $0x370] sm:$0xff] }
  0x9f   : > { %334 = vxpose.xlu1.b32.cont [15/16] %v1611_v41, 128 }
  0xa0   : > { %267 = vxpose.xlu0.b32.cont [15/16] %v251_v42, 128 }
  0xa1   : > { %402 = vxpose.xlu2.b32.cont [15/16] %v1627_v46, 128  ;;  %v1687_v46 = vld [vmem:[%s2172_s7 + $0x350] sm:$0xff] }
  0xa7   : > { %335 = vxpose.xlu1.b32.end [16/16] %v1612_v44, 128  ;;  %v1641_v44 = vld [vmem:[%s2172_s7 + $0x1e0] sm:$0xff] }
  0xa8   : > { %268 = vxpose.xlu0.b32.end [16/16] %v252_v45, 128  ;;  %v808_v45 = vld [vmem:[#allocation6 + $0x68] sm:$0xff] }
  0xa9   : > { %403 = vxpose.xlu2.b32.end [16/16] %v1628_v49, 128  ;;  %817 = vmatpush.msra.mxu0 %v808_v45  ;;  %v806_v49 = vld [vmem:[#allocation6 + $0x58] sm:$0xff] }
  0xaa   : > { %1721 = vmatpush.msra.mxu1 %v808_v45  ;;  %1722 = vmatpush.msra.mxu2 %v808_v45 }
  0xab   : > { %1723 = vmatpush.msra.mxu3 %v808_v45 }
  0xaf   : > { %524 = vxpose.xlu1.b32.start [1/16] %v1645_v47, 128  ;;  %v807_v47 = vld [vmem:[#allocation6 + $0x60] sm:$0xff] }
  0xb0   : > { %456 = vxpose.xlu0.b32.start [1/16] %v1629_v48, 128  ;;  %818 = vmatpush.msra.mxu0 %v807_v47 }
  0xb1   : > { %660 = vxpose.xlu2.b32.start [1/16] %v1677_v52, 128  ;;  %1724 = vmatpush.msra.mxu1 %v807_v47 }
  0xb2   : > { %1725 = vmatpush.msra.mxu2 %v807_v47  ;;  %819 = vmatpush.msra.mxu0 %v806_v49 }
  0xb3   : > { %1727 = vmatpush.msra.mxu1 %v806_v49  ;;  %1726 = vmatpush.msra.mxu3 %v807_v47 }
  0xb4   : > { %1728 = vmatpush.msra.mxu2 %v806_v49 }
  0xb5   : > { %1729 = vmatpush.msra.mxu3 %v806_v49  ;;  %v1692_v49 = vld [vmem:[%s2172_s7 + $0x378] sm:$0xff] }
  0xb7   : > { %525 = vxpose.xlu1.b32.cont [2/16] %v1646_v50, 128  ;;  %v805_v50 = vld [vmem:[#allocation6 + $0x50] sm:$0xff] }
  0xb8   : > { %457 = vxpose.xlu0.b32.cont [2/16] %v1630_v51, 128  ;;  %820 = vmatpush.msra.mxu0 %v805_v50 }
  0xb9   : > { %661 = vxpose.xlu2.b32.cont [2/16] %v1678_v57, 128  ;;  %1730 = vmatpush.msra.mxu1 %v805_v50  ;;  %v803_v57 = vld [vmem:[#allocation6 + $0x40] sm:$0xff] }
  0xba   : > { %1731 = vmatpush.msra.mxu2 %v805_v50  ;;  %1732 = vmatpush.msra.mxu3 %v805_v50  ;;  %v1694_v50 = vld [vmem:[%s2172_s7 + $0x388] sm:$0xff] }
  0xbf   : > { %526 = vxpose.xlu1.b32.cont [3/16] %v1647_v53, 128  ;;  %v1658_v53 = vld [vmem:[%s2172_s7 + $0x268] sm:$0xff] }
  0xc0   : > { %458 = vxpose.xlu0.b32.cont [3/16] %v1631_v54, 128  ;;  %v1642_v54 = vld [vmem:[%s2172_s7 + $0x1e8] sm:$0xff] }
  0xc1   : > { %662 = vxpose.xlu2.b32.cont [3/16] %v1679_v60, 128  ;;  %v801_v60 = vld [vmem:[#allocation6 + $0x30] sm:$0xff] }
  0xc7   : > { %527 = vxpose.xlu1.b32.cont [4/16] %v1648_v55, 128  ;;  %v804_v55 = vld [vmem:[#allocation6 + $0x48] sm:$0xff] }
  0xc8   : > { %459 = vxpose.xlu0.b32.cont [4/16] %v1632_v56, 128  ;;  %v1688_v56 = vld [vmem:[%s2172_s7 + $0x358] sm:$0xff]  ;;  %821 = vmatpush.msra.mxu0 %v804_v55 }
  0xc9   : > { %663 = vxpose.xlu2.b32.cont [4/16] %v1680_v1, 128  ;;  %1733 = vmatpush.msra.mxu1 %v804_v55  ;;  %v1659_v1 = vld [vmem:[%s2172_s7 + $0x270] sm:$0xff] }
  0xca   : > { %v2250_v2 = vpop.trf.xlu2  ;;  %822 = vmatpush.msra.mxu0 %v803_v57  ;;  %1734 = vmatpush.msra.mxu2 %v804_v55 }
  0xcb   : > { %1736 = vmatpush.msra.mxu1 %v803_v57  ;;  %1735 = vmatpush.msra.mxu3 %v804_v55 }
  0xcc   : > { %1737 = vmatpush.msra.mxu2 %v803_v57 }
  0xcd   : > { %1738 = vmatpush.msra.mxu3 %v803_v57 }
  0xcf   : > { %528 = vxpose.xlu1.b32.cont [5/16] %v1649_v58, 128 }
  0xd0   : > { %460 = vxpose.xlu0.b32.cont [5/16] %v1633_v59, 128  ;;  %v802_v59 = vld [vmem:[#allocation6 + $0x38] sm:$0xff] }
  0xd1   : > { %664 = vxpose.xlu2.b32.cont [5/16] %v1681_v7, 128  ;;  %823 = vmatpush.msra.mxu0 %v802_v59  ;;  %v1689_v7 = vld [vmem:[%s2172_s7 + $0x360] sm:$0xff] }
  0xd2   : > { %v2259_v8 = vpop.trf.xlu2  ;;  %1739 = vmatpush.msra.mxu1 %v802_v59  ;;  %1740 = vmatpush.msra.mxu2 %v802_v59 }
  0xd3   : > { %v2243_v61 = vpop.trf.xlu1  ;;  %824 = vmatpush.msra.mxu0 %v801_v60  ;;  %1741 = vmatpush.msra.mxu3 %v802_v59 }
  0xd4   : > { %v2245_v62 = vpop.trf.xlu0  ;;  %1742 = vmatpush.msra.mxu1 %v801_v60  ;;  %1743 = vmatpush.msra.mxu2 %v801_v60 }
  0xd5   : > { %1744 = vmatpush.msra.mxu3 %v801_v60 }
  0xd7   : > { %529 = vxpose.xlu1.b32.cont [6/16] %v1650_v63, 128 }
  0xd8   : > { %461 = vxpose.xlu0.b32.cont [6/16] %v1634_v0, 128 }
  0xd9   : > { %665 = vxpose.xlu2.b32.cont [6/16] %v1682_v13, 128  ;;  %v798_v13 = vld [vmem:[#allocation6 + $0x18] sm:$0xff] }
  0xda   : > { %v2268_v14 = vpop.trf.xlu2 }
  0xdb   : > { %v2252_v3 = vpop.trf.xlu1 }
  0xdc   : > { %v2254_v4 = vpop.trf.xlu0 }
  0xdf   : > { %530 = vxpose.xlu1.b32.cont [7/16] %v1651_v5, 128  ;;  %v1643_v5 = vld [vmem:[%s2172_s7 + $0x1f0] sm:$0xff] }
  0xe0   : > { %462 = vxpose.xlu0.b32.cont [7/16] %v1635_v6, 128  ;;  %v800_v6 = vld [vmem:[#allocation6 + $0x28] sm:$0xff] }
  0xe1   : > { %666 = vxpose.xlu2.b32.cont [7/16] %v1683_v19, 128  ;;  %825 = vmatpush.msra.mxu0 %v800_v6 }
  0xe2   : > { %v2277_v20 = vpop.trf.xlu2  ;;  %1745 = vmatpush.msra.mxu1 %v800_v6  ;;  %1746 = vmatpush.msra.mxu2 %v800_v6 }
  0xe3   : > { %v2261_v9 = vpop.trf.xlu1  ;;  %1747 = vmatpush.msra.mxu3 %v800_v6 }
  0xe4   : > { %v2263_v10 = vpop.trf.xlu0 }
  0xe7   : > { %531 = vxpose.xlu1.b32.cont [8/16] %v1652_v11, 128  ;;  %v799_v11 = vld [vmem:[#allocation6 + $0x20] sm:$0xff] }
  0xe8   : > { %463 = vxpose.xlu0.b32.cont [8/16] %v1636_v12, 128  ;;  %826 = vmatpush.msra.mxu0 %v799_v11 }
  0xe9   : > { %667 = vxpose.xlu2.b32.cont [8/16] %v1684_v25, 128  ;;  %1748 = vmatpush.msra.mxu1 %v799_v11  ;;  %v796_v25 = vld [vmem:[#allocation6 + $0x8] sm:$0xff] }
  0xea   : > { %v2286_v26 = vpop.trf.xlu2  ;;  %827 = vmatpush.msra.mxu0 %v798_v13  ;;  %1749 = vmatpush.msra.mxu2 %v799_v11 }
  0xeb   : > { %v2270_v15 = vpop.trf.xlu1  ;;  %1751 = vmatpush.msra.mxu1 %v798_v13  ;;  %1750 = vmatpush.msra.mxu3 %v799_v11 }
  0xec   : > { %v2272_v16 = vpop.trf.xlu0  ;;  %1752 = vmatpush.msra.mxu2 %v798_v13 }
  0xed   : > { %1753 = vmatpush.msra.mxu3 %v798_v13 }
  0xef   : > { %532 = vxpose.xlu1.b32.cont [9/16] %v1653_v17, 128  ;;  %v797_v17 = vld [vmem:[#allocation6 + $0x10] sm:$0xff] }
  0xf0   : > { %464 = vxpose.xlu0.b32.cont [9/16] %v1637_v18, 128  ;;  %828 = vmatpush.msra.mxu0 %v797_v17 }
  0xf1   : > { %668 = vxpose.xlu2.b32.cont [9/16] %v1685_v31, 128  ;;  %1754 = vmatpush.msra.mxu1 %v797_v17 }
  0xf2   : > { %v2295_v32 = vpop.trf.xlu2  ;;  %829 = vmatpush.msra.mxu0 %v796_v25  ;;  %1755 = vmatpush.msra.mxu2 %v797_v17 }
  0xf3   : > { %v2279_v21 = vpop.trf.xlu1  ;;  %1757 = vmatpush.msra.mxu1 %v796_v25  ;;  %1756 = vmatpush.msra.mxu3 %v797_v17 }
  0xf4   : > { %v2281_v22 = vpop.trf.xlu0  ;;  %1758 = vmatpush.msra.mxu2 %v796_v25 }
  0xf5   : > { %1759 = vmatpush.msra.mxu3 %v796_v25 }
  0xf7   : > { %533 = vxpose.xlu1.b32.cont [10/16] %v1654_v23, 128  ;;  %v1660_v23 = vld [vmem:[%s2172_s7 + $0x278] sm:$0xff] }
  0xf8   : > { %465 = vxpose.xlu0.b32.cont [10/16] %v1638_v24, 128  ;;  %v1644_v24 = vld [vmem:[%s2172_s7 + $0x1f8] sm:$0xff] }
  0xf9   : > { %669 = vxpose.xlu2.b32.cont [10/16] %v1686_v37, 128  ;;  %v1693_v37 = vld [vmem:[%s2172_s7 + $0x380] sm:$0xff] }
  0xfa   : > { %v2304_v38 = vpop.trf.xlu2 }
  0xfb   : > { %v2288_v27 = vpop.trf.xlu1 }
  0xfc   : > { %v2290_v28 = vpop.trf.xlu0 }
  0xff   : > { %534 = vxpose.xlu1.b32.cont [11/16] %v1655_v29, 128  ;;  %v1690_v29 = vld [vmem:[%s2172_s7 + $0x368] sm:$0xff] }
 0x100   : > { %466 = vxpose.xlu0.b32.cont [11/16] %v1639_v30, 128  ;;  %v795_v30 = vld [vmem:[#allocation6] sm:$0xff] }
 0x101   : > { %670 = vxpose.xlu2.b32.cont [11/16] %v1687_v46, 128  ;;  %830 = vmatpush.msra.mxu0 %v795_v30 }
 0x102   : > { %v2313_v48 = vpop.trf.xlu2  ;;  %1760 = vmatpush.msra.mxu1 %v795_v30  ;;  %1761 = vmatpush.msra.mxu2 %v795_v30 }
 0x103   : > { %v2297_v33 = vpop.trf.xlu1  ;;  %1762 = vmatpush.msra.mxu3 %v795_v30 }
 0x104   : > { %v2299_v34 = vpop.trf.xlu0 }
 0x107   : > { %535 = vxpose.xlu1.b32.cont [12/16] %v1656_v35, 128 }
 0x108   : > { %467 = vxpose.xlu0.b32.cont [12/16] %v1640_v36, 128 }
 0x109   : > { %671 = vxpose.xlu2.b32.cont [12/16] %v1688_v56, 128 }
 0x10a   : > { %v2322_v58 = vpop.trf.xlu2 }
 0x10b   : > { %v2306_v41 = vpop.trf.xlu1 }
 0x10c   : > { %v2308_v42 = vpop.trf.xlu0 }
 0x10f   : > { %536 = vxpose.xlu1.b32.cont [13/16] %v1657_v43, 128 }
 0x110   : > { %468 = vxpose.xlu0.b32.cont [13/16] %v1641_v44, 128  ;;  %v420_v44 = vadd.f32 %v2268_v14, %v2250_v2  ;;  %v427_v2 = vadd.f32 %v2277_v20, %v2259_v8  ;;  %v1663_v8 = vld [vmem:[%s2172_s7 + $0x290] sm:$0xff] }
 0x111   : > { %672 = vxpose.xlu2.b32.cont [13/16] %v1689_v7, 128 }
 0x112   : > { %v2331_v12 = vpop.trf.xlu2  ;;  %v421_v45 = vadd.f32 %v420_v44, %v2286_v26  ;;  %v285_v26 = vadd.f32 %v2263_v10, %v2245_v62  ;;  %v428_v56 = vadd.f32 %v427_v2, %v2295_v32  ;;  %v292_v10 = vadd.f32 %v2272_v16, %v2254_v4  ;;  %v1666_v2 = vld [vmem:[%s2172_s7 + $0x2a8] sm:$0xff] }
 0x113   : > { %v2315_v51 = vpop.trf.xlu1 }
 0x114   : > { %v2317_v52 = vpop.trf.xlu0  ;;  %v422_v14 = vadd.f32 %v421_v45, %v2304_v38  ;;  %v286_v55 = vadd.f32 %v285_v26, %v2281_v22  ;;  %v429_v6 = vadd.f32 %v428_v56, %v2313_v48  ;;  %v293_v32 = vadd.f32 %v292_v10, %v2290_v28 }
 0x115   : > { %v352_v48 = vadd.f32 %v2261_v9, %v2243_v61 }
 0x116   : > { %v423_v57 = vadd.f32 %v422_v14, %v2322_v58  ;;  %v430_v58 = vadd.f32 %v429_v6, %v2331_v12  ;;  %v294_v13 = vadd.f32 %v293_v32, %v2308_v42 }
 0x117   : > { %537 = vxpose.xlu1.b32.cont [14/16] %v1658_v53, 128  ;;  %v1662_v53 = vld [vmem:[%s2172_s7 + $0x288] sm:$0xff]  ;;  %v353_v25 = vadd.f32 %v352_v48, %v2279_v21 }
 0x118   : > { %469 = vxpose.xlu0.b32.cont [14/16] %v1642_v54, 128 }
 0x119   : > { %673 = vxpose.xlu2.b32.cont [14/16] %v1690_v29, 128  ;;  %v354_v42 = vadd.f32 %v353_v25, %v2297_v33 }
 0x11a   : > { %v414_v31 = vpop.trf.xlu2 }
 0x11b   : > { %v2324_v63 = vpop.trf.xlu1  ;;  %v424_v62 = vadd.f32 %v423_v57, %v414_v31  ;;  %v1699_v57 = vld [vmem:[%s2172_s7 + $0x3b0] sm:$0xff] }
 0x11c   : > { %v2326_v0 = vpop.trf.xlu0 }
 0x11d   : > { %v295_v4 = vadd.f32 %v294_v13, %v2326_v0 }
 0x11f   : > { %538 = vxpose.xlu1.b32.cont [15/16] %v1659_v1, 128  ;;  %v287_v1 = vadd.f32 %v286_v55, %v2299_v34 }
 0x120   : > { %470 = vxpose.xlu0.b32.cont [15/16] %v1643_v5, 128  ;;  %v1695_v5 = vld [vmem:[%s2172_s7 + $0x390] sm:$0xff] }
 0x121   : > { %674 = vxpose.xlu2.b32.cont [15/16] %v1691_v40, 128  ;;  %v288_v20 = vadd.f32 %v287_v1, %v2317_v52  ;;  %v1697_v40 = vld [vmem:[%s2172_s7 + $0x3a0] sm:$0xff] }
 0x122   : > { %v415_v43 = vpop.trf.xlu2 }
 0x123   : > { %v2333_v18 = vpop.trf.xlu1  ;;  %v431_v28 = vadd.f32 %v430_v58, %v415_v43  ;;  %v1701_v58 = vld [vmem:[%s2172_s7 + $0x3c0] sm:$0xff] }
 0x124   : > { %v2335_v19 = vpop.trf.xlu0 }
 0x125   : > { %v289_v22 = vadd.f32 %v288_v20, %v2335_v19  ;;  %v1700_v20 = vld [vmem:[%s2172_s7 + $0x3b8] sm:$0xff] }
 0x127   : > { %539 = vxpose.xlu1.b32.end [16/16] %v1660_v23, 128  ;;  %v1696_v23 = vld [vmem:[%s2172_s7 + $0x398] sm:$0xff] }
 0x128   : > { %471 = vxpose.xlu0.b32.end [16/16] %v1644_v24, 128  ;;  %v1664_v24 = vld [vmem:[%s2172_s7 + $0x298] sm:$0xff] }
 0x129   : > { %675 = vxpose.xlu2.b32.end [16/16] %v1692_v49, 128 }
 0x12a   : > { %v416_v54 = vpop.trf.xlu2 }
 0x12b   : > { %v2340_v35 = vpop.trf.xlu1  ;;  %v425_v11 = vadd.f32 %v424_v62, %v416_v54  ;;  %v1698_v54 = vld [vmem:[%s2172_s7 + $0x3a8] sm:$0xff] }
 0x12c   : > { %v2342_v36 = vpop.trf.xlu0 }
 0x12d   : > { %v296_v61 = vadd.f32 %v295_v4, %v2342_v36  ;;  %v1665_v36 = vld [vmem:[%s2172_s7 + $0x2a0] sm:$0xff]  ;;  %v1670_v4 = vld [vmem:[%s2172_s7 + $0x2c8] sm:$0xff] }
 0x12f   : > { %728 = vxpose.xlu1.b32.start [1/16] %v1693_v37, 128  ;;  %v359_v37 = vadd.f32 %v2270_v15, %v2252_v3 }
 0x130   : > { %592 = vxpose.xlu0.b32.start [1/16] %v1661_v39, 128  ;;  %v355_v39 = vadd.f32 %v354_v42, %v2315_v51 }
 0x132   : > { %v417_v38 = vpop.trf.xlu2  ;;  %v356_v43 = vadd.f32 %v355_v39, %v2333_v18 }
 0x133   : > { %v2350_v46 = vpop.trf.xlu1  ;;  %v432_v31 = vadd.f32 %v431_v28, %v417_v38  ;;  %v1668_v38 = vld [vmem:[%s2172_s7 + $0x2b8] sm:$0xff] }
 0x134   : > { %v281_v47 = vpop.trf.xlu0  ;;  %v357_v49 = vadd.f32 %v356_v43, %v2350_v46 }
 0x135   : > { %v290_v34 = vadd.f32 %v289_v22, %v281_v47  ;;  %v360_v47 = vadd.f32 %v359_v37, %v2288_v27 }
 0x137   : > { %729 = vxpose.xlu1.b32.cont [2/16] %v1694_v50, 128  ;;  %v361_v15 = vadd.f32 %v360_v47, %v2306_v41  ;;  %v1673_v47 = vld [vmem:[%s2172_s7 + $0x2e0] sm:$0xff] }
 0x138   : > { %593 = vxpose.xlu0.b32.cont [2/16] %v1662_v53, 128 }
 0x139   : > { %v362_v53 = vadd.f32 %v361_v15, %v2324_v63  ;;  %v1667_v63 = vld [vmem:[%s2172_s7 + $0x2b0] sm:$0xff] }
 0x13a   : > { %v418_v19 = vpop.trf.xlu2 }
 0x13b   : > { %v2363_v59 = vpop.trf.xlu1  ;;  %v426_v12 = vadd.f32 %v425_v11, %v418_v19  ;;  %v363_v27 = vadd.f32 %v362_v53, %v2340_v35 }
 0x13c   : > { %v282_v60 = vpop.trf.xlu0 }
 0x13d   : > { %v2386_v9 = vmul.f32 0.125, %v426_v12  ;;  %v297_v0 = vadd.f32 %v296_v61, %v282_v60  ;;  %v364_v41 = vadd.f32 %v363_v27, %v2363_v59  ;;  %v1707_v27 = vld [vmem:[%s2172_s7 + $0x3f0] sm:$0xff] }
 0x13f   : > { %730 = vxpose.xlu1.b32.cont [3/16] %v1695_v5, 128  ;;  %843 = vmatmul.f32.vlgmr.msra.gmra.mxu1 %v2386_v9 }
 0x140   : > { %594 = vxpose.xlu0.b32.cont [3/16] %v1663_v8, 128 }
 0x142   : > { %v419_v33 = vpop.trf.xlu2 }
 0x143   : > { %v350_v7 = vpop.trf.xlu1  ;;  %v433_v45 = vadd.f32 %v432_v31, %v419_v33 }
 0x144   : > { %v283_v52 = vpop.trf.xlu0  ;;  %v358_v51 = vadd.f32 %v357_v49, %v350_v7  ;;  %v1669_v7 = vld [vmem:[%s2172_s7 + $0x2c0] sm:$0xff] }
 0x145   : > { %v291_v17 = vadd.f32 %v290_v34, %v283_v52  ;;  %v2401_v3 = vmul.f32 0.125, %v433_v45  ;;  %v1705_v45 = vld [vmem:[%s2172_s7 + $0x3e0] sm:$0xff] }
 0x146   : > { %v2409_v46 = vmul.f32 0.125, %v358_v51 }
 0x147   : > { %v2381_v16 = vmul.f32 0.125, %v291_v17  ;;  %731 = vxpose.xlu1.b32.cont [4/16] %v1696_v23, 128  ;;  %846 = vmatmul.f32.gmra.mxu1 %v2401_v3 }
 0x148   : > { %595 = vxpose.xlu0.b32.cont [4/16] %v1664_v24, 128  ;;  %v1702_v24 = vld [vmem:[%s2172_s7 + $0x3c8] sm:$0xff] }
 0x149   : > { %831 = vmatmul.f32.vlgmr.msra.gmra.mxu0 %v2381_v16 }
 0x14a   : > { %v676_v14 = vpop.trf.xlu2 }
 0x14b   : > { %v351_v29 = vpop.trf.xlu1 }
 0x14c   : > { %v284_v30 = vpop.trf.xlu0  ;;  %v365_v26 = vadd.f32 %v364_v41, %v351_v29  ;;  %v1671_v29 = vld [vmem:[%s2172_s7 + $0x2d0] sm:$0xff] }
 0x14d   : > { %v298_v21 = vadd.f32 %v297_v0, %v284_v30  ;;  %v1703_v0 = vld [vmem:[%s2172_s7 + $0x3d0] sm:$0xff] }
 0x14e   : > { %v2415_v60 = vmul.f32 0.125, %v365_v26 }
 0x14f   : > { %v2396_v44 = vmul.f32 0.125, %v298_v21  ;;  %732 = vxpose.xlu1.b32.cont [5/16] %v1697_v40, 128  ;;  %v1704_v21 = vld [vmem:[%s2172_s7 + $0x3d8] sm:$0xff] }
 0x150   : > { %596 = vxpose.xlu0.b32.cont [5/16] %v1665_v36, 128  ;;  %v1672_v40 = vld [vmem:[%s2172_s7 + $0x2d8] sm:$0xff] }
 0x151   : > { %834 = vmatmul.f32.gmra.mxu0 %v2396_v44 }
 0x152   : > { %v677_v35 = vpop.trf.xlu2 }
 0x153   : > { %v540_v18 = vpop.trf.xlu1 }
 0x154   : > { %v472_v50 = vpop.trf.xlu0 }
 0x157   : > { %733 = vxpose.xlu1.b32.cont [6/16] %v1698_v54, 128 }
 0x158   : > { %597 = vxpose.xlu0.b32.cont [6/16] %v1666_v2, 128 }
 0x159   : > { %837 = vmatmul.f32.gmra.mxu0 %v2409_v46 }
 0x15a   : > { %v678_v6 = vpop.trf.xlu2 }
 0x15b   : > { %v541_v55 = vpop.trf.xlu1  ;;  %v692_v62 = vadd.f32 %v678_v6, %v676_v14  ;;  %v1675_v14 = vld [vmem:[%s2172_s7 + $0x2f0] sm:$0xff] }
 0x15c   : > { %v473_v56 = vpop.trf.xlu0 }
 0x15f   : > { %734 = vxpose.xlu1.b32.cont [7/16] %v1699_v57, 128  ;;  %v1676_v57 = vld [vmem:[%s2172_s7 + $0x2f8] sm:$0xff] }
 0x160   : > { %598 = vxpose.xlu0.b32.cont [7/16] %v1667_v63, 128 }
 0x161   : > { %840 = vmatmul.f32.gmra.mxu0 %v2415_v60 }
 0x162   : > { %v679_v52 = vpop.trf.xlu2 }
 0x163   : > { %v542_v1 = vpop.trf.xlu1  ;;  %v699_v11 = vadd.f32 %v679_v52, %v677_v35 }
 0x164   : > { %v474_v59 = vpop.trf.xlu0  ;;  %v556_v5 = vadd.f32 %v542_v1, %v540_v18  ;;  %v1706_v18 = vld [vmem:[%s2172_s7 + $0x3e8] sm:$0xff] }
 0x165   : > { %v488_v8 = vadd.f32 %v474_v59, %v472_v50  ;;  %v1674_v50 = vld [vmem:[%s2172_s7 + $0x2e8] sm:$0xff] }
 0x167   : > { %735 = vxpose.xlu1.b32.cont [8/16] %v1700_v20, 128 }
 0x168   : > { %599 = vxpose.xlu0.b32.cont [8/16] %v1668_v38, 128 }
 0x16a   : > { %v680_v19 = vpop.trf.xlu2 }
 0x16b   : > { %v543_v10 = vpop.trf.xlu1  ;;  %v693_v28 = vadd.f32 %v692_v62, %v680_v19  ;;  %v2443_v19 = vld [vmem:[%s2845_s2] ss:$0 sm:$0xff] }
 0x16c   : > { %v475_v22 = vpop.trf.xlu0  ;;  %v563_v32 = vadd.f32 %v543_v10, %v541_v55 }
 0x16d   : > { %v495_v34 = vadd.f32 %v475_v22, %v473_v56  ;;  %v1708_v56 = vld [vmem:[%s2172_s7 + $0x3f8] sm:$0xff] }
 0x16f   : > { %736 = vxpose.xlu1.b32.cont [9/16] %v1701_v58, 128 }
 0x170   : > { %600 = vxpose.xlu0.b32.cont [9/16] %v1669_v7, 128 }
 0x172   : > { %v681_v30 = vpop.trf.xlu2 }
 0x173   : > { %v544_v48 = vpop.trf.xlu1  ;;  %v700_v31 = vadd.f32 %v699_v11, %v681_v30 }
 0x174   : > { %v476_v13 = vpop.trf.xlu0  ;;  %v557_v17 = vadd.f32 %v556_v5, %v544_v48 }
 0x175   : > { %v489_v23 = vadd.f32 %v488_v8, %v476_v13 }
 0x177   : > { %737 = vxpose.xlu1.b32.cont [10/16] %v1702_v24, 128 }
 0x178   : > { %601 = vxpose.xlu0.b32.cont [10/16] %v1670_v4, 128 }
 0x17a   : > { %v682_v36 = vpop.trf.xlu2 }
 0x17b   : > { %v545_v12 = vpop.trf.xlu1  ;;  %v694_v38 = vadd.f32 %v693_v28, %v682_v36 }
 0x17c   : > { %v477_v25 = vpop.trf.xlu0  ;;  %v2424_v61 = vadd.f32 %v563_v32, %v545_v12 }
 0x17d   : > { %v2426_v42 = vadd.f32 %v495_v34, %v477_v25 }
 0x17f   : > { %738 = vxpose.xlu1.b32.cont [11/16] %v1703_v0, 128 }
 0x180   : > { %602 = vxpose.xlu0.b32.cont [11/16] %v1671_v29, 128 }
 0x182   : > { %v683_v49 = vpop.trf.xlu2 }
 0x183   : > { %v546_v37 = vpop.trf.xlu1  ;;  %v701_v48 = vadd.f32 %v700_v31, %v683_v49 }
 0x184   : > { %v478_v39 = vpop.trf.xlu0  ;;  %v558_v10 = vadd.f32 %v557_v17, %v546_v37 }
 0x185   : > { %v490_v22 = vadd.f32 %v489_v23, %v478_v39 }
 0x187   : > { %739 = vxpose.xlu1.b32.cont [12/16] %v1704_v21, 128 }
 0x188   : > { %603 = vxpose.xlu0.b32.cont [12/16] %v1672_v40, 128 }
 0x18a   : > { %v684_v53 = vpop.trf.xlu2 }
 0x18b   : > { %v547_v43 = vpop.trf.xlu1  ;;  %v695_v32 = vadd.f32 %v694_v38, %v684_v53  ;;  %v2459_v53 = vld [vmem:[%s2846_s3] ss:$0 sm:$0xff] }
 0x18c   : > { %v479_v33 = vpop.trf.xlu0  ;;  %v565_v28 = vadd.f32 %v2424_v61, %v547_v43 }
 0x18d   : > { %v497_v17 = vadd.f32 %v2426_v42, %v479_v33 }
 0x18f   : > { %740 = vxpose.xlu1.b32.cont [13/16] %v1705_v45, 128 }
 0x190   : > { %604 = vxpose.xlu0.b32.cont [13/16] %v1673_v47, 128 }
 0x192   : > { %v685_v41 = vpop.trf.xlu2 }
 0x193   : > { %v548_v15 = vpop.trf.xlu1  ;;  %v702_v25 = vadd.f32 %v701_v48, %v685_v41 }
 0x194   : > { %v480_v51 = vpop.trf.xlu0  ;;  %v559_v34 = vadd.f32 %v558_v10, %v548_v15 }
 0x195   : > { %v491_v58 = vadd.f32 %v490_v22, %v480_v51 }
 0x197   : > { %741 = vxpose.xlu1.b32.cont [14/16] %v1706_v18, 128 }
 0x198   : > { %605 = vxpose.xlu0.b32.cont [14/16] %v1674_v50, 128 }
 0x19a   : > { %v686_v63 = vpop.trf.xlu2 }
 0x19b   : > { %v549_v54 = vpop.trf.xlu1  ;;  %v696_v13 = vadd.f32 %v695_v32, %v686_v63 }
 0x19c   : > { %v481_v2 = vpop.trf.xlu0  ;;  %v566_v37 = vadd.f32 %v565_v28, %v549_v54 }
 0x19d   : > { %v498_v39 = vadd.f32 %v497_v17, %v481_v2 }
 0x19f   : > { %742 = vxpose.xlu1.b32.cont [15/16] %v1707_v27, 128 }
 0x1a0   : > { %606 = vxpose.xlu0.b32.cont [15/16] %v1675_v14, 128 }
 0x1a2   : > { %v687_v59 = vpop.trf.xlu2 }
 0x1a3   : > { %v550_v26 = vpop.trf.xlu1  ;;  %v703_v42 = vadd.f32 %v702_v25, %v687_v59 }
 0x1a4   : > { %v482_v55 = vpop.trf.xlu0  ;;  %v560_v52 = vadd.f32 %v559_v34, %v550_v26 }
 0x1a5   : > { %v492_v11 = vadd.f32 %v491_v58, %v482_v55 }
 0x1a7   : > { %743 = vxpose.xlu1.b32.end [16/16] %v1708_v56, 128 }
 0x1a8   : > { %607 = vxpose.xlu0.b32.end [16/16] %v1676_v57, 128 }
 0x1aa   : > { %v688_v20 = vpop.trf.xlu2 }
 0x1ab   : > { %v551_v35 = vpop.trf.xlu1  ;;  %v697_v30 = vadd.f32 %v696_v13, %v688_v20 }
 0x1ac   : > { %v483_v1 = vpop.trf.xlu0  ;;  %v567_v45 = vadd.f32 %v566_v37, %v551_v35 }
 0x1ad   : > { %v499_v61 = vadd.f32 %v498_v39, %v483_v1 }
 0x1b2   : > { %v689_v7 = vpop.trf.xlu2 }
 0x1b3   : > { %v552_v5 = vpop.trf.xlu1  ;;  %v704_v27 = vadd.f32 %v703_v42, %v689_v7 }
 0x1b4   : > { %v484_v8 = vpop.trf.xlu0  ;;  %v561_v24 = vadd.f32 %v560_v52, %v552_v5 }
 0x1b5   : > { %v493_v4 = vadd.f32 %v492_v11, %v484_v8 }
 0x1ba   : > { %v690_v47 = vpop.trf.xlu2 }
 0x1bb   : > { %v553_v6 = vpop.trf.xlu1  ;;  %v698_v43 = vadd.f32 %v697_v30, %v690_v47 }
 0x1bc   : > { %v485_v62 = vpop.trf.xlu0  ;;  %v568_v33 = vadd.f32 %v567_v45, %v553_v6  ;;  %v844_v51 = vpop.f32.mrf.mxu1 }
 0x1bd   : > { %v500_v49 = vadd.f32 %v499_v61, %v485_v62  ;;  %v2454_v15 = vmul.f32 0.125, %v698_v43  ;;  %v845_v30 = vadd.f32 %v2443_v19, %v844_v51 }
 0x1bf   : > { %867 = vmatmul.f32.vlgmr.msra.gmra.mxu3 %v2454_v15 }
 0x1c2   : > { %v691_v63 = vpop.trf.xlu2 }
 0x1c3   : > { %v554_v23 = vpop.trf.xlu1  ;;  %v705_v35 = vadd.f32 %v704_v27, %v691_v63 }
 0x1c4   : > { %v486_v12 = vpop.trf.xlu0  ;;  %v562_v0 = vadd.f32 %v561_v24, %v554_v23  ;;  %v847_v20 = vpop.f32.mrf.mxu1 }
 0x1c5   : > { %v494_v29 = vadd.f32 %v493_v4, %v486_v12  ;;  %v2470_v1 = vmul.f32 0.125, %v705_v35  ;;  %v848_v10 = vadd.f32 %v2443_v19, %v847_v20 }
 0x1c6   : > { %v832_v31 = vpop.f32.mrf.mxu0  ;;  %v2447_v21 = vmul.f32 0.125, %v562_v0 }
 0x1c7   : > { %v2449_v40 = vmul.f32 0.125, %v494_v29  ;;  %v833_v36 = vadd.f32 %v2443_v19, %v832_v31  ;;  %870 = vmatmul.f32.gmra.mxu3 %v2470_v1 }
 0x1c8   : > { %855 = vmatmul.f32.vlgmr.msra.gmra.mxu2 %v2447_v21 }
 0x1c9   : > { %1828 = vtanh.f32 %v833_v36  ;;  %849 = vmatmul.f32.gmra.mxu1 %v2449_v40 }
 0x1cb   : > { %v555_v18 = vpop.trf.xlu1 }
 0x1cc   : > { %v487_v50 = vpop.trf.xlu0  ;;  %v569_v54 = vadd.f32 %v568_v33, %v555_v18 }
 0x1cd   : > { %v501_v2 = vadd.f32 %v500_v49, %v487_v50 }
 0x1ce   : > { %v835_v14 = vpop.f32.mrf.mxu0  ;;  %v2462_v26 = vmul.f32 0.125, %v569_v54 }
 0x1cf   : > { %v1829_v41 = vpop.eup %1828  ;;  %v2464_v55 = vmul.f32 0.125, %v501_v2  ;;  %v836_v56 = vadd.f32 %v2443_v19, %v835_v14 }
 0x1d0   : > { %v900_v57 = vmul.f32 %v1829_v41, %v2459_v53  ;;  %858 = vmatmul.f32.gmra.mxu2 %v2462_v26 }
 0x1d1   : > { %1830 = vtanh.f32 %v836_v56  ;;  %852 = vmatmul.f32.gmra.mxu1 %v2464_v55 }
 0x1d2   : > { %916 = vadd.xlane.f32.xlu2 %v900_v57 }
 0x1d3   : > { %v744_v59 = vpop.trf.xlu1 }
 0x1d4   : > { %v608_v5 = vpop.trf.xlu0 }
 0x1d6   : > { %v838_v8 = vpop.f32.mrf.mxu0 }
 0x1d7   : > { %v1831_v38 = vpop.eup %1830  ;;  %v839_v6 = vadd.f32 %v2443_v19, %v838_v8 }
 0x1d8   : > { %v901_v62 = vmul.f32 %v1831_v38, %v2459_v53 }
 0x1d9   : > { %1832 = vtanh.f32 %v839_v6 }
 0x1da   : > { %918 = vadd.xlane.f32.xlu2 %v901_v62  ;;  %1834 = vtanh.f32 %v848_v10 }
 0x1db   : > { %v745_v22 = vpop.trf.xlu1  ;;  %1836 = vtanh.f32 %v845_v30 }
 0x1dc   : > { %v609_v32 = vpop.trf.xlu0 }
 0x1de   : > { %v841_v43 = vpop.f32.mrf.mxu0 }
 0x1df   : > { %v1833_v34 = vpop.eup %1832  ;;  %v842_v33 = vadd.f32 %v2443_v19, %v841_v43 }
 0x1e0   : > { %v902_v58 = vmul.f32 %v1833_v34, %v2459_v53  ;;  %v1835_v7 = vpop.eup %1834 }
 0x1e1   : > { %v905_v24 = vmul.f32 %v1835_v7, %v2459_v53  ;;  %v1837_v45 = vpop.eup %1836  ;;  %1838 = vtanh.f32 %v842_v33 }
 0x1e2   : > { %920 = vadd.xlane.f32.xlu2 %v902_v58  ;;  %v904_v42 = vmul.f32 %v1837_v45, %v2459_v53 }
 0x1e3   : > { %v746_v52 = vpop.trf.xlu1 }
 0x1e4   : > { %v610_v11 = vpop.trf.xlu0  ;;  %v760_v48 = vadd.f32 %v746_v52, %v744_v59 }
 0x1e5   : > { %v624_v13 = vadd.f32 %v610_v11, %v608_v5 }
 0x1e7   : > { %v1839_v50 = vpop.eup %1838 }
 0x1e8   : > { %v903_v2 = vmul.f32 %v1839_v50, %v2459_v53 }
 0x1ea   : > { %926 = vadd.xlane.f32.xlu2 %v905_v24 }
 0x1eb   : > { %v747_v4 = vpop.trf.xlu1 }
 0x1ec   : > { %v611_v28 = vpop.trf.xlu0  ;;  %v767_v17 = vadd.f32 %v747_v4, %v745_v22 }
 0x1ed   : > { %v631_v23 = vadd.f32 %v611_v28, %v609_v32 }
 0x1f3   : > { %v748_v12 = vpop.trf.xlu1 }
 0x1f4   : > { %v612_v25 = vpop.trf.xlu0  ;;  %v761_v0 = vadd.f32 %v760_v48, %v748_v12 }
 0x1f5   : > { %v625_v29 = vadd.f32 %v624_v13, %v612_v25 }
 0x1fb   : > { %v749_v37 = vpop.trf.xlu1 }
 0x1fc   : > { %v613_v31 = vpop.trf.xlu0  ;;  %v768_v39 = vadd.f32 %v767_v17, %v749_v37 }
 0x1fd   : > { %v632_v36 = vadd.f32 %v631_v23, %v613_v31 }
 0x203   : > { %v750_v47 = vpop.trf.xlu1 }
 0x204   : > { %v614_v61 = vpop.trf.xlu0  ;;  %v762_v20 = vadd.f32 %v761_v0, %v750_v47 }
 0x205   : > { %v626_v38 = vadd.f32 %v625_v29, %v614_v61 }
 0x207   : > { %924 = vadd.xlane.f32.xlu1 %v904_v42 }
 0x20b   : > { %v751_v49 = vpop.trf.xlu1 }
 0x20c   : > { %v615_v18 = vpop.trf.xlu0  ;;  %v769_v52 = vadd.f32 %v768_v39, %v751_v49 }
 0x20d   : > { %v633_v13 = vadd.f32 %v632_v36, %v615_v18 }
 0x213   : > { %v752_v54 = vpop.trf.xlu1 }
 0x214   : > { %v616_v51 = vpop.trf.xlu0  ;;  %v763_v6 = vadd.f32 %v762_v20, %v752_v54 }
 0x215   : > { %v627_v62 = vadd.f32 %v626_v38, %v616_v51 }
 0x219   : > { %922 = vadd.xlane.f32.xlu0 %v903_v2 }
 0x21b   : > { %v753_v27 = vpop.trf.xlu1 }
 0x21c   : > { %v617_v14 = vpop.trf.xlu0  ;;  %v770_v4 = vadd.f32 %v769_v52, %v753_v27 }
 0x21d   : > { %v634_v12 = vadd.f32 %v633_v13, %v617_v14 }
 0x223   : > { %v754_v41 = vpop.trf.xlu1 }
 0x224   : > { %v618_v56 = vpop.trf.xlu0  ;;  %v764_v10 = vadd.f32 %v763_v6, %v754_v41 }
 0x225   : > { %v628_v22 = vadd.f32 %v627_v62, %v618_v56 }
 0x22b   : > { %v755_v57 = vpop.trf.xlu1 }
 0x22c   : > { %v619_v63 = vpop.trf.xlu0  ;;  %v771_v25 = vadd.f32 %v770_v4, %v755_v57 }
 0x22d   : > { %v635_v0 = vadd.f32 %v634_v12, %v619_v63 }
 0x233   : > { %v756_v35 = vpop.trf.xlu1 }
 0x234   : > { %v620_v59 = vpop.trf.xlu0  ;;  %v765_v32 = vadd.f32 %v764_v10, %v756_v35 }
 0x235   : > { %v629_v34 = vadd.f32 %v628_v22, %v620_v59 }
 0x23b   : > { %v757_v5 = vpop.trf.xlu1 }
 0x23c   : > { %v621_v8 = vpop.trf.xlu0  ;;  %v772_v29 = vadd.f32 %v771_v25, %v757_v5 }
 0x23d   : > { %v636_v30 = vadd.f32 %v635_v0, %v621_v8 }
 0x242   : > { %v868_v27 = vpop.f32.mrf.mxu3 }
 0x243   : > { %v758_v58 = vpop.trf.xlu1  ;;  %v869_v56 = vadd.f32 %v2443_v19, %v868_v27 }
 0x244   : > { %v622_v7 = vpop.trf.xlu0  ;;  %v766_v11 = vadd.f32 %v765_v32, %v758_v58 }
 0x245   : > { %v630_v48 = vadd.f32 %v629_v34, %v622_v7  ;;  %v2514_v25 = vpop.xlane.xlu2 %916 }
 0x246   : > { %v850_v24 = vpop.f32.mrf.mxu1  ;;  %v2482_v28 = vmul.f32 0.125, %v766_v11 }
 0x247   : > { %v2484_v17 = vmul.f32 0.125, %v630_v48  ;;  %v851_v23 = vadd.f32 %v2443_v19, %v850_v24 }
 0x248   : > { %873 = vmatmul.f32.gmra.mxu3 %v2482_v28 }
 0x249   : > { %1840 = vtanh.f32 %v851_v23  ;;  %861 = vmatmul.f32.gmra.mxu2 %v2484_v17 }
 0x24a   : > { %v871_v63 = vpop.f32.mrf.mxu3 }
 0x24b   : > { %v856_v37 = vpop.f32.mrf.mxu2  ;;  %v759_v31 = vpop.trf.xlu1  ;;  %v872_v59 = vadd.f32 %v2443_v19, %v871_v63 }
 0x24c   : > { %v857_v39 = vadd.f32 %v2443_v19, %v856_v37  ;;  %v773_v36 = vadd.f32 %v772_v29, %v759_v31  ;;  %v623_v45 = vpop.trf.xlu0 }
 0x24d   : > { %v637_v47 = vadd.f32 %v636_v30, %v623_v45  ;;  %v2516_v0 = vpop.xlane.xlu2 %918 }
 0x24e   : > { %1842 = vtanh.f32 %v857_v39  ;;  %v2490_v42 = vmul.f32 0.125, %v773_v36  ;;  %v853_v8 = vpop.f32.mrf.mxu1 }
 0x24f   : > { %v1841_v61 = vpop.eup %1840  ;;  %v2492_v43 = vmul.f32 0.125, %v637_v47  ;;  %v854_v38 = vadd.f32 %v2443_v19, %v853_v8  ;;  %v964_v47 = vlaneseq }
 0x250   : > { %v906_v33 = vmul.f32 %v1841_v61, %v2459_v53  ;;  %876 = vmatmul.f32.gmra.mxu3 %v2490_v42 }
 0x251   : > { %864 = vmatmul.f32.gmra.mxu2 %v2492_v43  ;;  %v2536_v61 = vand.u32 127, %v964_v47 }
 0x252   : > { %928 = vadd.xlane.f32.xlu2 %v906_v33 }
 0x253   : > { %v859_v49 = vpop.f32.mrf.mxu2  ;;  %v966_v27 = vperm.slane %v2514_v25, %v2536_v61 }
 0x254   : > { %v1843_v18 = vpop.eup %1842  ;;  %v860_v50 = vadd.f32 %v2443_v19, %v859_v49  ;;  %v2541_v49 = vadd.s32 4294967288, %v2536_v61 }
 0x255   : > { %v908_v54 = vmul.f32 %v1843_v18, %v2459_v53  ;;  %v2518_v29 = vpop.xlane.xlu2 %920 }
 0x256   : > { %1844 = vtanh.f32 %v860_v50 }
 0x25a   : > { %932 = vadd.xlane.f32.xlu2 %v908_v54  ;;  %v968_v54 = vperm.slane %v2516_v0, %v2541_v49 }
 0x25c   : > { %v1845_v51 = vpop.eup %1844 }
 0x25d   : > { %v909_v2 = vmul.f32 %v1845_v51, %v2459_v53  ;;  %v2520_v30 = vpop.xlane.xlu2 %926  ;;  %v971_v51 = vperm.slane %v2518_v29, %v2536_v61 }
 0x262   : > { %934 = vadd.xlane.f32.xlu2 %v909_v2 }
 0x27a   : > { %v2549_v2 = vpop.xlane.xlu1 %924 }
 0x28c   : > { %v2538_v33 = vpop.xlane.xlu0 %922 }
 0x28d   : > { %v972_v50 = vperm.slane %v2538_v33, %v2541_v49 }
 0x2c5   : > { %v2522_v37 = vpop.xlane.xlu2 %928 }
 0x2c6   : > { %v977_v63 = vperm.slane %v2522_v37, %v2536_v61 }
 0x2cb   : > { %v874_v34 = vpop.f32.mrf.mxu3 }
 0x2cc   : > { %v862_v14 = vpop.f32.mrf.mxu2  ;;  %v875_v7 = vadd.f32 %v2443_v19, %v874_v34 }
 0x2cd   : > { %v863_v41 = vadd.f32 %v2443_v19, %v862_v14  ;;  %v973_v14 = vsel %vm969_vm0, %v972_v50, %v971_v51  ;;  %v2043_v51 = vmov 0  }
 0x2ce   : > { %1824 = vset.pattern.permute.xlu2 %v2043_v51  ;;  %1823 = vset.pattern.permute.xlu1 %v2043_v51 }
 0x2cf   : > { %1846 = vtanh.f32 %v863_v41  ;;  %1825 = vset.pattern.permute.xlu0 %v2043_v51 }
 0x2d0   : > { %1848 = vtanh.f32 %v869_v56  ;;  %v974_v56 = vperm.slane %v2549_v2, %v2536_v61 }
 0x2d1   : > { %1850 = vtanh.f32 %v872_v59 }
 0x2d2   : > { %1852 = vtanh.f32 %v854_v38 }
 0x2d3   : > { %v877_v11 = vpop.f32.mrf.mxu3 }
 0x2d4   : > { %v865_v62 = vpop.f32.mrf.mxu2  ;;  %v878_v13 = vadd.f32 %v2443_v19, %v877_v11 }
 0x2d5   : > { %v1847_v57 = vpop.eup %1846  ;;  %v866_v22 = vadd.f32 %v2443_v19, %v865_v62  ;;  %v2524_v19 = vpop.xlane.xlu2 %932 }
 0x2d6   : > { %v910_v35 = vmul.f32 %v1847_v57, %v2459_v53  ;;  %v1849_v5 = vpop.eup %1848  ;;  %v970_v57 = vsel %vm969_vm0, %v968_v54, %v966_v27 }
 0x2d7   : > { %v912_v20 = vmul.f32 %v1849_v5, %v2459_v53  ;;  %v1851_v6 = vpop.eup %1850  ;;  %1854 = vtanh.f32 %v866_v22  ;;  %v993_v59 = vsel %vm992_vm1, %v973_v14, %v970_v57  ;;  %v980_v22 = vperm.slane %v2524_v19, %v2536_v61 }
 0x2d8   : > { %936 = vadd.xlane.f32.xlu2 %v910_v35  ;;  %v913_v10 = vmul.f32 %v1851_v6, %v2459_v53  ;;  %v1853_v32 = vpop.eup %1852  ;;  %1856 = vtanh.f32 %v875_v7  ;;  %v975_v35 = vperm.slane %v2520_v30, %v2541_v49 }
 0x2d9   : > { %v907_v58 = vmul.f32 %v1853_v32, %v2459_v53  ;;  %1858 = vtanh.f32 %v878_v13 }
 0x2da   : > { %v976_v38 = vsel %vm969_vm0, %v975_v35, %v974_v56 }
 0x2dd   : > { %v1855_v52 = vpop.eup %1854  ;;  %v2526_v31 = vpop.xlane.xlu2 %934 }
 0x2de   : > { %v911_v48 = vmul.f32 %v1855_v52, %v2459_v53  ;;  %v1857_v24 = vpop.eup %1856  ;;  %v981_v6 = vperm.slane %v2526_v31, %v2541_v49 }
 0x2df   : > { %v914_v4 = vmul.f32 %v1857_v24, %v2459_v53  ;;  %v1859_v23 = vpop.eup %1858 }
 0x2e0   : > { %940 = vadd.xlane.f32.xlu2 %v912_v20  ;;  %v915_v12 = vmul.f32 %v1859_v23, %v2459_v53 }
 0x2e8   : > { %942 = vadd.xlane.f32.xlu2 %v913_v10  ;;  %v995_v10 = vsel %vm994_vm2, %v976_v38, %v993_v59 }
 0x2f0   : > { %930 = vadd.xlane.f32.xlu2 %v907_v58  ;;  %v982_v58 = vsel %vm969_vm0, %v981_v6, %v980_v22 }
 0x2f8   : > { %938 = vadd.xlane.f32.xlu2 %v911_v48 }
 0x300   : > { %944 = vadd.xlane.f32.xlu2 %v914_v4 }
 0x308   : > { %946 = vadd.xlane.f32.xlu2 %v915_v12 }
 0x34b   : > { %v2528_v39 = vpop.xlane.xlu2 %936 }
 0x34c   : > { %v983_v62 = vperm.slane %v2528_v39, %v2536_v61 }
 0x353   : > { %v2530_v36 = vpop.xlane.xlu2 %940 }
 0x354   : > { %v986_v11 = vperm.slane %v2530_v36, %v2536_v61 }
 0x35b   : > { %v2532_v53 = vpop.xlane.xlu2 %942 }
 0x35c   : > { %v987_v7 = vperm.slane %v2532_v53, %v2541_v49 }
 0x35e   : > { %v988_v23 = vsel %vm969_vm0, %v987_v7, %v986_v11 }
 0x363   : > { %v2534_v45 = vpop.xlane.xlu2 %930 }
 0x364   : > { %v978_v41 = vperm.slane %v2534_v45, %v2541_v49 }
 0x366   : > { %v979_v8 = vsel %vm969_vm0, %v978_v41, %v977_v63 }
 0x367   : > { %v997_v32 = vsel %vm996_vm3, %v979_v8, %v995_v10 }
 0x368   : > { %v999_v52 = vsel %vm998_vm4, %v982_v58, %v997_v32 }
 0x36b   : > { %v939_v18 = vpop.xlane.xlu2 %938 }
 0x36c   : > { %v984_v20 = vperm.slane %v939_v18, %v2541_v49 }
 0x36e   : > { %v985_v34 = vsel %vm969_vm0, %v984_v20, %v983_v62 }
 0x36f   : > { %v1001_v13 = vsel %vm1000_vm5, %v985_v34, %v999_v52 }
 0x370   : > { %v1003_v47 = vsel %vm1002_vm6, %v988_v23, %v1001_v13 }
 0x373   : > { %v945_v5 = vpop.xlane.xlu2 %944 }
 0x374   : > { %v989_v24 = vperm.slane %v945_v5, %v2536_v61 }
 0x37b   : > { %v2582_v48 = vpop.xlane.xlu2 %946 }
 0x37c   : > { %v990_v4 = vperm.slane %v2582_v48, %v2541_v49 }
 0x37e   : > { %v991_v12 = vsel %vm969_vm0, %v990_v4, %v989_v24 }
 0x37f   : > { %v1005_v50 = vsel %vm1004_vm7, %v991_v12, %v1003_v47 }
 0x380   : > { %v1008_v54 = vsel %vm1007_vm8, %v1005_v50, -inf }
 0x381   : > { %1009 = vmax.xlane.f32.xlu2 %v1008_v54 }
 0x3f4   : > { %v2593_v27 = vpop.xlane.xlu2 %1009 }
 0x3f5   : > { %v1013_v14 = vperm.slane %v2593_v27, 1  ;;  %v1017_v56 = vperm.slane %v2593_v27, 5  ;;  %v1012_v35 = vperm.slane %v2593_v27, 0  ;;  %v1019_v59 = vperm.slane %v2593_v27, 7 }
 0x3f6   : > { %v1015_v34 = vperm.slane %v2593_v27, 3  ;;  %v1016_v13 = vperm.slane %v2593_v27, 4 }
 0x3f7   : > { %v1030_v41 = vsub.f32 %v2518_v29, %v1013_v14  ;;  %v1039_v63 = vsub.f32 %v939_v18, %v1017_v56  ;;  %v1029_v20 = vsub.f32 %v2516_v0, %v1012_v35  ;;  %v1028_v38 = vsub.f32 %v2514_v25, %v1012_v35 }
 0x3f8   : > { %v1042_v29 = vsub.f32 %v945_v5, %v1019_v59  ;;  %v1014_v18 = vperm.slane %v2593_v27, 2  ;;  %v1031_v0 = vsub.f32 %v2538_v33, %v1013_v14  ;;  %v1038_v14 = vsub.f32 %v2528_v39, %v1017_v56 }
 0x3f9   : > { %v1048_v57 = vmul.f32 1.442695, %v1030_v41  ;;  %v1066_v8 = vmul.f32 1.442695, %v1039_v63  ;;  %v1046_v62 = vmul.f32 1.442695, %v1029_v20 }
 0x3fa   : > { %v1044_v10 = vmul.f32 1.442695, %v1028_v38  ;;  %v1072_v22 = vmul.f32 1.442695, %v1042_v29  ;;  %v1032_v32 = vsub.f32 %v2549_v2, %v1014_v18  ;;  %v1050_v58 = vmul.f32 1.442695, %v1031_v0 }
 0x3fb   : > { %1860 = vpow2.f32 %v1048_v57  ;;  %v1034_v2 = vsub.f32 %v2522_v37, %v1015_v34  ;;  %v1033_v33 = vsub.f32 %v2520_v30, %v1014_v18  ;;  %v1036_v37 = vsub.f32 %v2524_v19, %v1016_v13 }
 0x3fc   : > { %1862 = vpow2.f32 %v1066_v8  ;;  %v1052_v5 = vmul.f32 1.442695, %v1032_v32  ;;  %v1035_v30 = vsub.f32 %v2534_v45, %v1015_v34  ;;  %v1037_v19 = vsub.f32 %v2526_v31, %v1016_v13 }
 0x3fd   : > { %1864 = vpow2.f32 %v1046_v62  ;;  %v1056_v24 = vmul.f32 1.442695, %v1034_v2  ;;  %v1054_v4 = vmul.f32 1.442695, %v1033_v33  ;;  %v1060_v47 = vmul.f32 1.442695, %v1036_v37 }
 0x3fe   : > { %1866 = vpow2.f32 %v1044_v10  ;;  %v1058_v50 = vmul.f32 1.442695, %v1035_v30  ;;  %v1018_v41 = vperm.slane %v2593_v27, 6  ;;  %v1064_v45 = vmul.f32 1.442695, %v1038_v14 }
 0x3ff   : > { %1868 = vpow2.f32 %v1072_v22  ;;  %v1062_v57 = vmul.f32 1.442695, %v1037_v19 }
 0x400   : > { %1870 = vpow2.f32 %v1052_v5  ;;  %v1041_v8 = vsub.f32 %v2532_v53, %v1018_v41  ;;  %v1040_v39 = vsub.f32 %v2530_v36, %v1018_v41  ;;  %v1043_v53 = vsub.f32 %v2582_v48, %v1019_v59 }
 0x401   : > { %v2602_v6 = vpop.eup %1860  ;;  %1872 = vpow2.f32 %v1050_v58 }
 0x402   : > { %1099 = vperm.xlu0 %1825, %v2602_v6   ;;  %v2610_v25 = vpop.eup %1862  ;;  %1874 = vpow2.f32 %v1056_v24  ;;  %v1070_v31 = vmul.f32 1.442695, %v1041_v8  ;;  %v1068_v56 = vmul.f32 1.442695, %v1040_v39  ;;  %v1074_v29 = vmul.f32 1.442695, %v1043_v53 }
 0x403   : > { %v2614_v7 = vpop.eup %1864  ;;  %1876 = vpow2.f32 %v1054_v4 }
 0x404   : > { %v2616_v52 = vpop.eup %1866  ;;  %1096 = vperm.xlu2 %1824, %v2614_v7   ;;  %1878 = vpow2.f32 %v1060_v47 }
 0x405   : > { %1093 = vperm.xlu1 %1823, %v2616_v52   ;;  %v2622_v11 = vpop.eup %1868  ;;  %1880 = vpow2.f32 %v1058_v50 }
 0x406   : > { %v2626_v23 = vpop.eup %1870  ;;  %1882 = vpow2.f32 %v1064_v45 }
 0x407   : > { %v2628_v12 = vpop.eup %1872  ;;  %1884 = vpow2.f32 %v1062_v57 }
 0x408   : > { %v2634_v54 = vpop.eup %1874  ;;  %1886 = vpow2.f32 %v1070_v31 }
 0x409   : > { %v2636_v51 = vpop.eup %1876  ;;  %1888 = vpow2.f32 %v1068_v56 }
 0x40a   : > { %1126 = vperm.xlu0 %1825, %v2610_v25   ;;  %v2643_v63 = vpop.eup %1878  ;;  %1890 = vpow2.f32 %v1074_v29 }
 0x40b   : > { %v2645_v35 = vpop.eup %1880 }
 0x40c   : > { %1105 = vperm.xlu2 %1824, %v2626_v23   ;;  %v2651_v20 = vpop.eup %1882 }
 0x40d   : > { %1102 = vperm.xlu1 %1823, %v2628_v12   ;;  %v2653_v38 = vpop.eup %1884 }
 0x40e   : > { %v2660_v62 = vpop.eup %1886 }
 0x40f   : > { %v2662_v36 = vpop.eup %1888 }
 0x410   : > { %v2666_v18 = vpop.eup %1890 }
 0x412   : > { %1135 = vperm.xlu0 %1825, %v2622_v11  }
 0x414   : > { %1111 = vperm.xlu2 %1824, %v2634_v54  }
 0x415   : > { %1108 = vperm.xlu1 %1823, %v2636_v51  }
 0x41c   : > { %1117 = vperm.xlu2 %1824, %v2643_v63  }
 0x41d   : > { %1114 = vperm.xlu1 %1823, %v2645_v35  }
 0x424   : > { %1123 = vperm.xlu2 %1824, %v2651_v20  }
 0x425   : > { %1120 = vperm.xlu1 %1823, %v2653_v38  }
 0x42c   : > { %1132 = vperm.xlu2 %1824, %v2660_v62  }
 0x42d   : > { %1129 = vperm.xlu1 %1823, %v2662_v36  }
 0x435   : > { %1138 = vperm.xlu1 %1823, %v2666_v18  }
 0x45e   : > { %v1097_v10 = vpop.permute.xlu2 %1096 }
 0x45f   : > { %v1141_v19 = vperm.slane %v1097_v10, %v2541_v49 }
 0x466   : > { %v1106_v27 = vpop.permute.xlu2 %1105 }
 0x467   : > { %v1146_v47 = vperm.slane %v1106_v27, %v2536_v61 }
 0x46e   : > { %v1112_v48 = vpop.permute.xlu2 %1111 }
 0x46f   : > { %v1149_v41 = vperm.slane %v1112_v48, %v2536_v61 }
 0x474   : > { %v1100_v5 = vpop.permute.xlu0 %1099 }
 0x475   : > { %v1143_v4 = vperm.slane %v1100_v5, %v2536_v61 }
 0x476   : > { %v1118_v0 = vpop.permute.xlu2 %1117 }
 0x477   : > { %v1094_v22 = vpop.permute.xlu1 %1093  ;;  %v1152_v57 = vperm.slane %v1118_v0, %v2536_v61 }
 0x478   : > { %v1140_v37 = vperm.slane %v1094_v22, %v2536_v61 }
 0x47a   : > { %v1142_v39 = vsel %vm969_vm0, %v1141_v19, %v1140_v37 }
 0x47c   : > { %v1127_v33 = vpop.permute.xlu0 %1126 }
 0x47d   : > { %v1156_v10 = vperm.slane %v1127_v33, %v2541_v49 }
 0x47e   : > { %v1124_v2 = vpop.permute.xlu2 %1123 }
 0x47f   : > { %v1103_v32 = vpop.permute.xlu1 %1102  ;;  %v1155_v27 = vperm.slane %v1124_v2, %v2536_v61 }
 0x480   : > { %v1144_v13 = vperm.slane %v1103_v32, %v2541_v49 }
 0x482   : > { %v1145_v45 = vsel %vm969_vm0, %v1144_v13, %v1143_v4  ;;  %v1157_v13 = vsel %vm969_vm0, %v1156_v10, %v1155_v27 }
 0x483   : > { %v1164_v53 = vsel %vm992_vm1, %v1145_v45, %v1142_v39 }
 0x484   : > { %v1136_v48 = vpop.permute.xlu0 %1135 }
 0x486   : > { %v1133_v31 = vpop.permute.xlu2 %1132 }
 0x487   : > { %v1109_v59 = vpop.permute.xlu1 %1108 }
 0x488   : > { %v1147_v24 = vperm.slane %v1109_v59, %v2541_v49  ;;  %v1159_v59 = vperm.slane %v1133_v31, %v2541_v49 }
 0x48a   : > { %v1148_v8 = vsel %vm969_vm0, %v1147_v24, %v1146_v47  ;;  %v1161_v24 = vperm.slane %v1136_v48, %v2536_v61 }
 0x48b   : > { %v1165_v32 = vsel %vm994_vm2, %v1148_v8, %v1164_v53 }
 0x48f   : > { %v1115_v34 = vpop.permute.xlu1 %1114 }
 0x490   : > { %v1150_v30 = vperm.slane %v1115_v34, %v2541_v49 }
 0x492   : > { %v1151_v56 = vsel %vm969_vm0, %v1150_v30, %v1149_v41 }
 0x493   : > { %v1166_v0 = vsel %vm996_vm3, %v1151_v56, %v1165_v32 }
 0x497   : > { %v1121_v58 = vpop.permute.xlu1 %1120 }
 0x498   : > { %v1153_v50 = vperm.slane %v1121_v58, %v2541_v49 }
 0x49a   : > { %v1154_v29 = vsel %vm969_vm0, %v1153_v50, %v1152_v57 }
 0x49b   : > { %v1167_v34 = vsel %vm998_vm4, %v1154_v29, %v1166_v0 }
 0x49c   : > { %v1168_v2 = vsel %vm1000_vm5, %v1157_v13, %v1167_v34 }
 0x49f   : > { %v1130_v14 = vpop.permute.xlu1 %1129 }
 0x4a0   : > { %v1158_v22 = vperm.slane %v1130_v14, %v2536_v61 }
 0x4a2   : > { %v1160_v5 = vsel %vm969_vm0, %v1159_v59, %v1158_v22 }
 0x4a3   : > { %v1169_v37 = vsel %vm1002_vm6, %v1160_v5, %v1168_v2 }
 0x4a7   : > { %v1139_v58 = vpop.permute.xlu1 %1138 }
 0x4a8   : > { %v1162_v33 = vperm.slane %v1139_v58, %v2541_v49 }
 0x4aa   : > { %v1163_v4 = vsel %vm969_vm0, %v1162_v33, %v1161_v24 }
 0x4ab   : > { %v1170_v30 = vsel %vm1004_vm7, %v1163_v4, %v1169_v37 }
 0x4ac   : > { %v1172_v47 = vsel %vm1007_vm8, %v1170_v30, 0.0 }
 0x4ad   : > { %1173 = vadd.xlane.f32.xlu2 %v1172_v47 }
 0x520   : > { %v2701_v50 = vpop.xlane.xlu2 %1173 }
 0x521   : > { %v1176_v14 = vperm.slane %v2701_v50, 0  ;;  %v1177_v19 = vperm.slane %v2701_v50, 1  ;;  %v2706_v61 = vperm.slane %v2701_v50, 2  ;;  %v1181_v49 = vperm.slane %v2701_v50, 5 }
 0x522   : > { %v2711_v45 = vperm.slane %v2701_v50, 3  ;;  %v2719_v0 = vperm.slane %v2701_v50, 4 }
 0x523   : > { %1892 = vrcp.f32 %v1176_v14  ;;  %v1201_v53 = vand.u32 2147483647, %v1176_v14  ;;  %v1203_v29 = vand.u32 2147483648, %v1176_v14  ;;  %v1281_v34 = vand.u32 2147483647, %v1181_v49 }
 0x524   : > { %1894 = vrcp.f32 %v1177_v19  ;;  %vm1197_vm10 = vweird.f32 %v1176_v14  ;;  %v1283_v13 = vand.u32 2147483648, %v1181_v49  ;;  %vm1213_vm15 = vweird.f32 %v1177_v19 }
 0x525   : > { %1896 = vrcp.f32 %v2706_v61  ;;  %vm1202_vm12 = vcmp.eq.f32.partialorder %v1201_v53, 8.507059e+37  ;;  %v1204_v24 = vor.u32 1.1754944e-38, %v1203_v29  ;;  %vm1277_vm0 = vweird.f32 %v1181_v49 }
 0x526   : > { %1898 = vrcp.f32 %v1181_v49  ;;  %v1284_v29 = vor.u32 1.1754944e-38, %v1283_v13 }
 0x527   : > { %1900 = vrcp.f32 %v2711_v45 }
 0x528   : > { %1902 = vrcp.f32 %v2719_v0 }
 0x529   : > { %v1893_v41 = vpop.eup %1892 }
 0x52a   : > { %v1895_v57 = vpop.eup %1894  ;;  %v1193_v8 = vmul.f32 %v1893_v41, %v1176_v14  ;;  %vm1198_vm9 = vweird.f32 %v1893_v41  ;;  %v1217_v14 = vand.u32 2147483647, %v1177_v19 }
 0x52b   : > { %v2713_v39 = vpop.eup %1896  ;;  %v1209_v31 = vmul.f32 %v1895_v57, %v1177_v19  ;;  %vm1199_vm11 = vmor %vm1197_vm10, %vm1198_vm9  ;;  %vm1214_vm13 = vweird.f32 %v1895_v57  ;;  %vm1282_vm10 = vcmp.eq.f32.partialorder %v1281_v34, 8.507059e+37 }
 0x52c   : > { %v1194_v56 = vsub.f32 1.0, %v1193_v8  ;;  %v1899_v10 = vpop.eup %1898  ;;  %v1225_v32 = vmul.f32 %v2713_v39, %v2706_v61  ;;  %v1219_v8 = vand.u32 2147483648, %v1177_v19  ;;  %vm2726_vm8 = vmor %vm1213_vm15, %vm1214_vm13  ;;  %vm1229_vm13 = vweird.f32 %v2706_v61 }
 0x52d   : > { %v1210_v22 = vsub.f32 1.0, %v1209_v31  ;;  %v1273_v48 = vmul.f32 %v1899_v10, %v1181_v49  ;;  %v2721_v37 = vpop.eup %1900  ;;  %vm1278_vm14 = vweird.f32 %v1899_v10 }
 0x52e   : > { %v1195_v27 = vmul.f32 %v1893_v41, %v1194_v56  ;;  %v1226_v4 = vsub.f32 1.0, %v1225_v32  ;;  %vm1279_vm9 = vmor %vm1277_vm0, %vm1278_vm14  ;;  %v2738_v32 = vperm.slane %v2701_v50, 6  ;;  %vm1246_vm0 = vweird.f32 %v2721_v37 }
 0x52f   : > { %v1211_v59 = vmul.f32 %v1895_v57, %v1210_v22  ;;  %v1274_v58 = vsub.f32 1.0, %v1273_v48 }
 0x530   : > { %v1196_v5 = vadd.f32 %v1893_v41, %v1195_v27  ;;  %v1220_v27 = vor.u32 1.1754944e-38, %v1219_v8  ;;  %1904 = vrcp.f32 %v2738_v32  ;;  %v1251_v8 = vand.u32 2147483648, %v2711_v45 }
 0x531   : > { %v1212_v2 = vadd.f32 %v1895_v57, %v1211_v59  ;;  %v1275_v30 = vmul.f32 %v1899_v10, %v1274_v58  ;;  %v1903_v58 = vpop.eup %1902 }
 0x532   : > { %v1200_v33 = vsel %vm1199_vm11, %v1893_v41, %v1196_v5  ;;  %vm1218_vm11 = vcmp.eq.f32.partialorder %v1217_v14, 8.507059e+37  ;;  %v1252_v41 = vor.u32 1.1754944e-38, %v1251_v8 }
 0x533   : > { %v1205_v47 = vsel %vm1202_vm12, %v1204_v24, %v1200_v33  ;;  %v1276_v53 = vadd.f32 %v1899_v10, %v1275_v30  ;;  %v1216_v22 = vsel %vm2726_vm8, %v1895_v57, %v1212_v2  ;;  %vm1230_vm12 = vweird.f32 %v2713_v39 }
 0x534   : > { %v1207_v31 = vmul.f32 %v2614_v7, %v1205_v47  ;;  %v1206_v56 = vmul.f32 %v2616_v52, %v1205_v47  ;;  %v1227_v7 = vmul.f32 %v2713_v39, %v1226_v4  ;;  %v1241_v52 = vmul.f32 %v2721_v37, %v2711_v45  ;;  %vm1231_vm14 = vmor %vm1229_vm13, %vm1230_vm12 }
 0x535   : > { %v1280_v19 = vsel %vm1279_vm9, %v1899_v10, %v1276_v53  ;;  %v1221_v59 = vsel %vm1218_vm11, %v1220_v27, %v1216_v22  ;;  %v1235_v10 = vand.u32 2147483648, %v2706_v61  ;;  %v1233_v24 = vand.u32 2147483647, %v2706_v61 }
 0x536   : > { %1327 = vperm.xlu1 %1823, %v1207_v31   ;;  %1322 = vperm.xlu0 %1825, %v1206_v56   ;;  %v2735_v49 = vsel %vm1282_vm10, %v1284_v29, %v1280_v19  ;;  %v1228_v57 = vadd.f32 %v2713_v39, %v1227_v7  ;;  %v1242_v5 = vsub.f32 1.0, %v1241_v52  ;;  %v1223_v34 = vmul.f32 %v2628_v12, %v1221_v59  ;;  %v1905_v47 = vpop.eup %1904 }
 0x537   : > { %v1286_v48 = vmul.f32 %v2651_v20, %v2735_v49  ;;  %v1222_v13 = vmul.f32 %v2602_v6, %v1221_v59  ;;  %v1257_v2 = vmul.f32 %v1903_v58, %v2719_v0  ;;  %v1236_v4 = vor.u32 1.1754944e-38, %v1235_v10 }
 0x538   : > { %v1232_v20 = vsel %vm1231_vm14, %v2713_v39, %v1228_v57  ;;  %v1243_v33 = vmul.f32 %v2721_v37, %v1242_v5  ;;  %vm1234_vm15 = vcmp.eq.f32.partialorder %v1233_v24, 8.507059e+37  ;;  %v2754_v12 = vperm.slane %v2701_v50, 7 }
 0x539   : > { %1372 = vperm.xlu2 %1824, %v1286_v48   ;;  %v1237_v6 = vsel %vm1234_vm15, %v1236_v4, %v1232_v20  ;;  %v1258_v61 = vsub.f32 1.0, %v1257_v2  ;;  %vm1245_vm8 = vweird.f32 %v2711_v45  ;;  %v1249_v56 = vand.u32 2147483647, %v2711_v45 }
 0x53a   : > { %v1244_v30 = vadd.f32 %v2721_v37, %v1243_v33  ;;  %v1239_v39 = vmul.f32 %v2636_v51, %v1237_v6  ;;  %v1238_v31 = vmul.f32 %v2626_v23, %v1237_v6  ;;  %1906 = vrcp.f32 %v2754_v12  ;;  %vm1247_vm9 = vmor %vm1245_vm8, %vm1246_vm0 }
 0x53b   : > { %v1259_v14 = vmul.f32 %v1903_v58, %v1258_v61  ;;  %v1289_v53 = vmul.f32 %v1905_v47, %v2738_v32  ;;  %vm1250_vm10 = vcmp.eq.f32.partialorder %v1249_v56, 8.507059e+37  ;;  %vm1262_vm11 = vweird.f32 %v1903_v58 }
 0x53c   : > { %v1248_v50 = vsel %vm1247_vm9, %v2721_v37, %v1244_v30  ;;  %v1267_v7 = vand.u32 2147483648, %v2719_v0  ;;  %vm1261_vm12 = vweird.f32 %v2719_v0  ;;  %v1265_v37 = vand.u32 2147483647, %v2719_v0 }
 0x53d   : > { %v1253_v29 = vsel %vm1250_vm10, %v1252_v41, %v1248_v50  ;;  %v1260_v51 = vadd.f32 %v1903_v58, %v1259_v14  ;;  %v1290_v23 = vsub.f32 1.0, %v1289_v53  ;;  %vm1263_vm13 = vmor %vm1261_vm12, %vm1262_vm11  ;;  %vm1294_vm15 = vweird.f32 %v1905_v47 }
 0x53e   : > { %1337 = vperm.xlu1 %1823, %v1223_v34   ;;  %1332 = vperm.xlu0 %1825, %v1222_v13   ;;  %v1255_v45 = vmul.f32 %v2645_v35, %v1253_v29  ;;  %v1254_v52 = vmul.f32 %v2634_v54, %v1253_v29  ;;  %v1268_v59 = vor.u32 1.1754944e-38, %v1267_v7  ;;  %vm1266_vm14 = vcmp.eq.f32.partialorder %v1265_v37, 8.507059e+37 }
 0x53f   : > { %v1264_v19 = vsel %vm1263_vm13, %v1903_v58, %v1260_v51  ;;  %v1291_v27 = vmul.f32 %v1905_v47, %v1290_v23  ;;  %v1299_v35 = vand.u32 2147483648, %v2738_v32  ;;  %vm1293_vm0 = vweird.f32 %v2738_v32 }
 0x540   : > { %v1907_v22 = vpop.eup %1906  ;;  %v1269_v57 = vsel %vm1266_vm14, %v1268_v59, %v1264_v19  ;;  %v1297_v0 = vand.u32 2147483647, %v2738_v32  ;;  %vm1295_vm8 = vmor %vm1293_vm0, %vm1294_vm15  ;;  %v1315_v2 = vand.u32 2147483648, %v2754_v12  ;;  %vm1309_vm11 = vweird.f32 %v2754_v12 }
 0x541   : > { %v1305_v48 = vmul.f32 %v1907_v22, %v2754_v12  ;;  %v1292_v5 = vadd.f32 %v1905_v47, %v1291_v27  ;;  %v1271_v54 = vmul.f32 %v2653_v38, %v1269_v57  ;;  %v1270_v34 = vmul.f32 %v2643_v63, %v1269_v57 }
 0x542   : > { %v1300_v24 = vor.u32 1.1754944e-38, %v1299_v35  ;;  %vm1298_vm9 = vcmp.eq.f32.partialorder %v1297_v0, 8.507059e+37  ;;  %vm1310_vm10 = vweird.f32 %v1907_v22  ;;  %v1287_v63 = vmul.f32 %v2610_v25, %v2735_v49 }
 0x543   : > { %v1306_v10 = vsub.f32 1.0, %v1305_v48  ;;  %v1296_v58 = vsel %vm1295_vm8, %v1905_v47, %v1292_v5  ;;  %v1313_v32 = vand.u32 2147483647, %v2754_v12  ;;  %vm1311_vm12 = vmor %vm1309_vm11, %vm1310_vm10  ;;  %v1316_v6 = vor.u32 1.1754944e-38, %v1315_v2 }
 0x544   : > { %v1301_v20 = vsel %vm1298_vm9, %v1300_v24, %v1296_v58 }
 0x545   : > { %v1307_v13 = vmul.f32 %v1907_v22, %v1306_v10  ;;  %v1302_v38 = vmul.f32 %v2662_v36, %v1301_v20  ;;  %vm1314_vm13 = vcmp.eq.f32.partialorder %v1313_v32, 8.507059e+37  ;;  %v1303_v47 = vmul.f32 %v2660_v62, %v1301_v20 }
 0x546   : > { %1347 = vperm.xlu1 %1823, %v1239_v39   ;;  %1342 = vperm.xlu0 %1825, %v1238_v31  }
 0x547   : > { %v1308_v33 = vadd.f32 %v1907_v22, %v1307_v13 }
 0x549   : > { %v1312_v4 = vsel %vm1311_vm12, %v1907_v22, %v1308_v33 }
 0x54a   : > { %v1317_v30 = vsel %vm1314_vm13, %v1316_v6, %v1312_v4 }
 0x54b   : > { %v1318_v61 = vmul.f32 %v2622_v11, %v1317_v30  ;;  %v1319_v36 = vmul.f32 %v2666_v18, %v1317_v30 }
 0x54e   : > { %1357 = vperm.xlu1 %1823, %v1255_v45   ;;  %1352 = vperm.xlu0 %1825, %v1254_v52  }
 0x556   : > { %1367 = vperm.xlu1 %1823, %v1271_v54   ;;  %1362 = vperm.xlu0 %1825, %v1270_v34  }
 0x55e   : > { %1382 = vperm.xlu1 %1823, %v1302_v38   ;;  %1377 = vperm.xlu0 %1825, %v1287_v63  }
 0x566   : > { %1392 = vperm.xlu1 %1823, %v1318_v61   ;;  %1387 = vperm.xlu0 %1825, %v1303_v47  }
 0x56e   : > { %1397 = vperm.xlu0 %1825, %v1319_v36  }
 0x593   : > { %v1373_v7 = vpop.permute.xlu2 %1372 }
 0x5a8   : > { %v1328_v25 = vpop.permute.xlu1 %1327  ;;  %v1323_v49 = vpop.permute.xlu0 %1322 }
 0x5a9   : > { %v1401_v62 = vmul.f32 %v1328_v25, %v2396_v44  ;;  %v1400_v29 = vmul.f32 %v1323_v49, %v2381_v16  ;;  %v1410_v44 = vmul.f32 %v1373_v7, %v2484_v17 }
 0x5ab   : > { %v1416_v37 = vadd.f32 %v1401_v62, %v1400_v29 }
 0x5b0   : > { %v1338_v8 = vpop.permute.xlu1 %1337  ;;  %v1333_v12 = vpop.permute.xlu0 %1332 }
 0x5b1   : > { %v1403_v41 = vmul.f32 %v1338_v8, %v2415_v60  ;;  %v1402_v11 = vmul.f32 %v1333_v12, %v2409_v46 }
 0x5b3   : > { %v1423_v60 = vadd.f32 %v1403_v41, %v1402_v11 }
 0x5b8   : > { %v1348_v39 = vpop.permute.xlu1 %1347  ;;  %v1343_v31 = vpop.permute.xlu0 %1342 }
 0x5b9   : > { %v1405_v18 = vmul.f32 %v1348_v39, %v2401_v3  ;;  %v1404_v51 = vmul.f32 %v1343_v31, %v2386_v9  ;;  %v1424_v9 = vrot.slane %v1423_v60, 4 }
 0x5bb   : > { %v1430_v46 = vadd.f32 %v1405_v18, %v1404_v51 }
 0x5bd   : > { %v1431_v59 = vrot.slane %v1430_v46, 4 }
 0x5bf   : > { %v1432_v35 = vadd.f32 %v1431_v59, %v1430_v46 }
 0x5c0   : > { %v1358_v56 = vpop.permute.xlu1 %1357  ;;  %v1353_v50 = vpop.permute.xlu0 %1352 }
 0x5c1   : > { %v1407_v23 = vmul.f32 %v1358_v56, %v2464_v55  ;;  %v1406_v22 = vmul.f32 %v1353_v50, %v2449_v40  ;;  %v1417_v55 = vrot.slane %v1416_v37, 4  ;;  %v1433_v33 = vrot.slane %v1432_v35, 2 }
 0x5c3   : > { %v1437_v16 = vadd.f32 %v1407_v23, %v1406_v22  ;;  %v1434_v47 = vadd.f32 %v1433_v33, %v1432_v35 }
 0x5c5   : > { %v1438_v57 = vrot.slane %v1437_v16, 4  ;;  %v1435_v56 = vrot.slane %v1434_v47, 1 }
 0x5c7   : > { %v1439_v34 = vadd.f32 %v1438_v57, %v1437_v16 }
 0x5c8   : > { %v1363_v14 = vpop.permute.xlu0 %1362  ;;  %v1368_v53 = vpop.permute.xlu1 %1367 }
 0x5c9   : > { %v1409_v45 = vmul.f32 %v1368_v53, %v2462_v26  ;;  %v1408_v52 = vmul.f32 %v1363_v14, %v2447_v21  ;;  %v1425_v26 = vadd.f32 %v1424_v9, %v1423_v60  ;;  %v1418_v21 = vadd.f32 %v1417_v55, %v1416_v37 }
 0x5ca   : > { %v1440_v2 = vrot.slane %v1439_v34, 2 }
 0x5cb   : > { %v1444_v27 = vadd.f32 %v1409_v45, %v1408_v52  ;;  %v1419_v20 = vrot.slane %v1418_v21, 2 }
 0x5cc   : > { %v1441_v25 = vadd.f32 %v1440_v2, %v1439_v34 }
 0x5cd   : > { %v1445_v5 = vrot.slane %v1444_v27, 4  ;;  %v1420_v61 = vadd.f32 %v1419_v20, %v1418_v21 }
 0x5ce   : > { %v1442_v53 = vrot.slane %v1441_v25, 1 }
 0x5cf   : > { %v1446_v58 = vadd.f32 %v1445_v5, %v1444_v27  ;;  %v1421_v14 = vrot.slane %v1420_v61, 1 }
 0x5d0   : > { %v1378_v19 = vpop.permute.xlu0 %1377  ;;  %v1383_v40 = vpop.permute.xlu1 %1382  ;;  %v1443_v22 = vadd.f32 %v1442_v53, %v1441_v25 }
 0x5d1   : > { %v1411_v3 = vmul.f32 %v1378_v19, %v2492_v43  ;;  %v1412_v0 = vmul.f32 %v1383_v40, %v2454_v15  ;;  %v1426_v43 = vrot.slane %v1425_v26, 2  ;;  %v1447_v63 = vrot.slane %v1446_v58, 2 }
 0x5d2   : > { %v1422_v23 = vadd.f32 %v1421_v14, %v1420_v61 }
 0x5d3   : > { %v1451_v48 = vadd.f32 %v1411_v3, %v1410_v44  ;;  %v1427_v4 = vadd.f32 %v1426_v43, %v1425_v26  ;;  %v1448_v8 = vadd.f32 %v1447_v63, %v1446_v58 }
 0x5d5   : > { %v1452_v10 = vrot.slane %v1451_v48, 4  ;;  %v1428_v12 = vrot.slane %v1427_v4, 1  ;;  %v1449_v11 = vrot.slane %v1448_v8, 1 }
 0x5d7   : > { %v1453_v13 = vadd.f32 %v1452_v10, %v1451_v48  ;;  %v1429_v62 = vadd.f32 %v1428_v12, %v1427_v4  ;;  %v1450_v7 = vadd.f32 %v1449_v11, %v1448_v8 }
 0x5d8   : > { %v1388_v54 = vpop.permute.xlu0 %1387  ;;  %v1393_v32 = vpop.permute.xlu1 %1392 }
 0x5d9   : > { %v1413_v17 = vmul.f32 %v1388_v54, %v2470_v1  ;;  %v1454_v6 = vrot.slane %v1453_v13, 2  ;;  %v1414_v15 = vmul.f32 %v1393_v32, %v2482_v28  ;;  %v1436_v28 = vadd.f32 %v1435_v56, %v1434_v47 }
 0x5da   : > { %v1480_v45 = vsel %vm992_vm1, %v1429_v62, %v1422_v23 }
 0x5db   : > { %v1458_v24 = vadd.f32 %v1413_v17, %v1412_v0  ;;  %v1455_v39 = vadd.f32 %v1454_v6, %v1453_v13  ;;  %v1481_v37 = vsel %vm994_vm2, %v1436_v28, %v1480_v45 }
 0x5dc   : > { %v1482_v19 = vsel %vm996_vm3, %v1443_v22, %v1481_v37 }
 0x5dd   : > { %v1459_v38 = vrot.slane %v1458_v24, 4  ;;  %v1456_v29 = vrot.slane %v1455_v39, 1  ;;  %v1483_v16 = vsel %vm998_vm4, %v1450_v7, %v1482_v19 }
 0x5df   : > { %v1460_v30 = vadd.f32 %v1459_v38, %v1458_v24  ;;  %v1457_v52 = vadd.f32 %v1456_v29, %v1455_v39 }
 0x5e0   : > { %v1398_v36 = vpop.permute.xlu0 %1397 }
 0x5e1   : > { %v1461_v1 = vrot.slane %v1460_v30, 2  ;;  %v1415_v49 = vmul.f32 %v1398_v36, %v2490_v42  ;;  %v1484_v27 = vsel %vm1000_vm5, %v1457_v52, %v1483_v16 }
 0x5e3   : > { %v1465_v31 = vadd.f32 %v1415_v49, %v1414_v15  ;;  %v1462_v50 = vadd.f32 %v1461_v1, %v1460_v30 }
 0x5e5   : > { %v1466_v41 = vrot.slane %v1465_v31, 4  ;;  %v1463_v51 = vrot.slane %v1462_v50, 1 }
 0x5e7   : > { %v1467_v18 = vadd.f32 %v1466_v41, %v1465_v31  ;;  %v1464_v46 = vadd.f32 %v1463_v51, %v1462_v50 }
 0x5e9   : > { %v1468_v42 = vrot.slane %v1467_v18, 2  ;;  %v1485_v9 = vsel %vm1002_vm6, %v1464_v46, %v1484_v27 }
 0x5eb   : > { %v1469_v60 = vadd.f32 %v1468_v42, %v1467_v18 }
 0x5ed   : > { %v1470_v44 = vrot.slane %v1469_v60, 1 }
 0x5ef   : > { %v1471_v3 = vadd.f32 %v1470_v44, %v1469_v60 }
 0x5f1   : > { %v1486_v48 = vsel %vm1004_vm7, %v1471_v3, %v1485_v9 }
 0x5f2   : > { %1488 = vst [vmem:[%s235_s19] sm:$0xff] %v1486_v48 }
 0x5f3   : > { %1995 = shalt.err (!%p1992_p10)
}
 0x5f4   : > { %1769 = dma.vmem_to_hbm [thread:$0]  (%p2138_p3), %s1503_s13, 128, %s1505_s12, %s1490_s14  }
 0x5f5 PF: > { %s1516_s10 = sand.u32 1, %s2026_s15   ;;  %p2855_p12 = scmp.ge.s32.totalorder %s2038_s18, 2 }
 0x5f6   : > { %s1517_s5 = scalar_lea.sflag [#allocation5], %s1516_s10 }
 0x5f7   : > { %p1780_p13 = pnand %p2855_p12, %p2104_p6 }
 0x5f9   : > { %p1781_p0 = pneg %p1780_p13 }
 0x5fb   : > { %2021 = dma.done.wait (%p1781_p0), %s1517_s5, 128  }
 0x5fc   : > { %2023 = vsyncadd (%p1781_p0), %s1517_s5, 4294967168  ;;  %p18_p5 = scmp.ge.s32.totalorder %s2122_s29, 4   ;;  %s2856_s15 = smov %s2030_s16 }
 0x5fd   : > { %s2857_s16 = smov %s2034_s17  ;;  %s2858_s17 = smov %s2134_s8 }
 0x5fe   : > { %s2859_s18 = smov %s2122_s29  ;;  %20 = sbr.rel (!%p18_p5) target bundleno = 6 (0x6), region = 99 }
 0x603   :  { %1523 = vsyncpa [#allocation4], 1 }
 0x604   :  { %1525 = vsyncpa [#allocation4 + $0x1], 1 }
 0x605   :  { %1526 = vsyncpa [#allocation7], 1 }
 0x606   :  { %1527 = vsyncpa [#allocation5], 1 }
 0x607   :  { %1529 = vsyncpa [#allocation5 + $0x1], 1 }

</bundles_post_ra>
